<compile_context>
chip_gen: v7x
topology: tpu7x:2x2x1
jax: 0.10.0
libtpu: 0.0.40
codegen_flags: <defaults>
</compile_context>

<pallas_src>
import functools
import math

import jax
import jax.numpy as jnp
from jax.experimental import pallas as pl
from jax.experimental.pallas import tpu as pltpu


_VMEM_LIMIT = 48 * 1024 * 1024   # <= v7x 64 MiB physical; > default scoped limit elsewhere
_ACT_DTYPE = jnp.bfloat16        # inter-kernel activation dtype (math/accum stays f32)
_WEIGHT_DTYPE = jnp.bfloat16     # HBM weight storage dtype


def _pick_tile(dim, target, align):
    """Largest multiple of `align` dividing `dim` that is <= target, else the full dim
    (a block equal to the full array dim is always layout-legal)."""
    if dim <= target or dim % align != 0:
        return dim
    t = (target // align) * align
    while t >= align:
        if dim % t == 0:
            return t
        t -= align
    return dim


# ----------------------------- token-emb + pos-emb add -----------------------------
# pos BlockSpec index_map ignores the batch index, so the (B, S, D) broadcast of
# the positional table is never materialized in HBM.

def _embed_add_kernel(tok_ref, pos_ref, o_ref):
    o_ref[...] = (tok_ref[...].astype(jnp.float32) +
                  pos_ref[...].astype(jnp.float32)).astype(o_ref.dtype)


def pallas_embed_add(tok, pos, ts=512):
    B, S, D = tok.shape
    ts = _pick_tile(S, ts, 8)
    return pl.pallas_call(
        _embed_add_kernel,
        out_shape=jax.ShapeDtypeStruct((B, S, D), _ACT_DTYPE),
        grid=(B, S // ts),
        in_specs=[pl.BlockSpec((1, ts, D), lambda b, si: (b, si, 0)),
                  pl.BlockSpec((ts, D), lambda b, si: (si, 0))],
        out_specs=pl.BlockSpec((1, ts, D), lambda b, si: (b, si, 0)),
        compiler_params=pltpu.CompilerParams(
            dimension_semantics=("parallel", "parallel"),
            vmem_limit_bytes=_VMEM_LIMIT),
    )(tok, pos)


# ----------------------------- fused QKV projection (head-major output) -----------------------------
# x (M, D) @ wqkv (D, 3D) + bqkv; single reduction grid (no 3-way output axis, so
# each x block is fetched exactly once). Finalize writes q/k/v as (H, M, Dh).

def _qkv_kernel(x_ref, w_ref, b_ref, q_ref, k_ref, v_ref, acc_ref, *,
                n_heads, d_head):
    kk = pl.program_id(1)

    @pl.when(kk == 0)
    def _():
        acc_ref[...] = jnp.zeros_like(acc_ref)

    acc_ref[...] += jnp.dot(x_ref[...], w_ref[...],
                            preferred_element_type=jnp.float32)

    @pl.when(kk == pl.num_programs(1) - 1)
    def _():
        y = acc_ref[...] + b_ref[...]
        d_model = n_heads * d_head
        # TODO(synk): when d_head < 128, pack 128 // d_head heads per output block
        # so these stores stay lane-dense (they are masked sub-128-lane stores here).
        for h in range(n_heads):
            lo = h * d_head
            q_ref[h] = y[:, lo:lo + d_head].astype(q_ref.dtype)
            k_ref[h] = y[:, d_model + lo:d_model + lo + d_head].astype(k_ref.dtype)
            v_ref[h] = y[:, 2 * d_model + lo:2 * d_model + lo + d_head].astype(v_ref.dtype)


def pallas_qkv_proj(x, wqkv, bqkv, n_heads, d_head, tm=512, tk=1024):
    M, K = x.shape
    D = n_heads * d_head
    tm = _pick_tile(M, tm, 8)
    tk = _pick_tile(K, tk, 128)
    out_sds = jax.ShapeDtypeStruct((n_heads, M, d_head), _ACT_DTYPE)
    out_spec = pl.BlockSpec((n_heads, tm, d_head), lambda i, kk: (0, i, 0))
    return pl.pallas_call(
        functools.partial(_qkv_kernel, n_heads=n_heads, d_head=d_head),
        out_shape=(out_sds, out_sds, out_sds),
        grid=(M // tm, K // tk),
        in_specs=[pl.BlockSpec((tm, tk), lambda i, kk: (i, kk)),
                  pl.BlockSpec((tk, 3 * D), lambda i, kk: (kk, 0)),
                  pl.BlockSpec((1, 3 * D), lambda i, kk: (0, 0))],
        out_specs=(out_spec, out_spec, out_spec),
        scratch_shapes=[pltpu.VMEM((tm, 3 * D), jnp.float32)],
        compiler_params=pltpu.CompilerParams(
            dimension_semantics=("parallel", "arbitrary"),
            vmem_limit_bytes=_VMEM_LIMIT),
    )(x, wqkv, bqkv.reshape(1, 3 * D))


# ----------------------------- flash-style multi-head attention -----------------------------
# Grid (H, B, q_tiles, kv_tiles); online-softmax accumulators in VMEM scratch so
# the (S, S) score matrix is never materialized. Softmax scale is already folded
# into the Q projection weights.

def _flash_attn_kernel(q_ref, k_ref, v_ref, mask_ref, o_ref, m_sc, l_sc, acc_sc):
    ki = pl.program_id(3)

    @pl.when(ki == 0)
    def _():
        m_sc[...] = jnp.full_like(m_sc, -1e30)
        l_sc[...] = jnp.zeros_like(l_sc)
        acc_sc[...] = jnp.zeros_like(acc_sc)

    q = q_ref[0, 0]                     # (tq, Dh) bf16
    k = k_ref[0, 0]                     # (tkv, Dh) bf16
    v = v_ref[0, 0]                     # (tkv, Dh) bf16
    # scores (tq, tkv): contract head dim directly (no k.T materialized)
    s = jax.lax.dot_general(q, k, (((1,), (1,)), ((), ())),
                            preferred_element_type=jnp.float32)
    s = s + mask_ref[0]                 # (1, tkv) additive key mask
    m_new = jnp.maximum(m_sc[...], jnp.max(s, axis=-1, keepdims=True))
    alpha = jnp.exp(m_sc[...] - m_new)
    p = jnp.exp(s - m_new)
    l_sc[...] = alpha * l_sc[...] + jnp.sum(p, axis=-1, keepdims=True)
    acc_sc[...] = alpha * acc_sc[...] + jnp.dot(p.astype(v.dtype), v,
                                                preferred_element_type=jnp.float32)
    m_sc[...] = m_new

    @pl.when(ki == pl.num_programs(3) - 1)
    def _():
        o_ref[0, 0] = (acc_sc[...] *
                       pl.reciprocal(l_sc[...], approx=True)).astype(o_ref.dtype)


def pallas_flash_attention(q, k, v, mask, tq=256, tkv=512):
    # q/k/v: (H, B, S, Dh); mask: (B, 1, S) additive (0 keep / -1e9 masked)
    H, B, S, Dh = q.shape
    tq = _pick_tile(S, tq, 8)
    tkv = _pick_tile(S, tkv, 128)
    return pl.pallas_call(
        _flash_attn_kernel,
        out_shape=jax.ShapeDtypeStruct((H, B, S, Dh), _ACT_DTYPE),
        grid=(H, B, S // tq, S // tkv),
        in_specs=[
            pl.BlockSpec((1, 1, tq, Dh), lambda h, b, qi, ki: (h, b, qi, 0)),
            pl.BlockSpec((1, 1, tkv, Dh), lambda h, b, qi, ki: (h, b, ki, 0)),
            pl.BlockSpec((1, 1, tkv, Dh), lambda h, b, qi, ki: (h, b, ki, 0)),
            pl.BlockSpec((1, 1, tkv), lambda h, b, qi, ki: (b, 0, ki)),
        ],
        out_specs=pl.BlockSpec((1, 1, tq, Dh), lambda h, b, qi, ki: (h, b, qi, 0)),
        scratch_shapes=[pltpu.VMEM((tq, 1), jnp.float32),
                        pltpu.VMEM((tq, 1), jnp.float32),
                        pltpu.VMEM((tq, Dh), jnp.float32)],
        compiler_params=pltpu.CompilerParams(
            dimension_semantics=("parallel", "parallel", "parallel", "arbitrary"),
            vmem_limit_bytes=_VMEM_LIMIT),
    )(q, k, v, mask)


# ----------------------------- wo projection (head-major lhs) + residual + LayerNorm -----------------------------
# attn (H, M, Dh) @ wo (H, Dh, D), reduced over the head axis, then
# y = LayerNorm(acc + bo + residual). Consuming head-major input avoids any
# XLA-side transpose of the attention output.

def _wo_addln_kernel(a_ref, w_ref, b_ref, r_ref, g_ref, bt_ref, o_ref,
                     acc_ref, *, eps):
    h = pl.program_id(1)

    @pl.when(h == 0)
    def _():
        acc_ref[...] = jnp.zeros_like(acc_ref)

    acc_ref[...] += jnp.dot(a_ref[0], w_ref[0],
                            preferred_element_type=jnp.float32)

    @pl.when(h == pl.num_programs(1) - 1)
    def _():
        y = acc_ref[...] + b_ref[...] + r_ref[...].astype(jnp.float32)
        mu = jnp.mean(y, axis=-1, keepdims=True)
        yc = y - mu
        var = jnp.mean(yc * yc, axis=-1, keepdims=True)
        inv = jax.lax.rsqrt(var + eps)
        o_ref[...] = (yc * inv * g_ref[...] + bt_ref[...]).astype(o_ref.dtype)


def pallas_wo_add_layernorm(attn, wo_hm, bo, residual, gamma, beta, eps=1e-5,
                            tm=512):
    H, M, Dh = attn.shape
    D = H * Dh
    tm = _pick_tile(M, tm, 8)
    return pl.pallas_call(
        functools.partial(_wo_addln_kernel, eps=eps),
        out_shape=jax.ShapeDtypeStruct((M, D), _ACT_DTYPE),
        grid=(M // tm, H),
        in_specs=[pl.BlockSpec((1, tm, Dh), lambda i, h: (h, i, 0)),
                  pl.BlockSpec((1, Dh, D), lambda i, h: (h, 0, 0)),
                  pl.BlockSpec((1, D), lambda i, h: (0, 0)),
                  pl.BlockSpec((tm, D), lambda i, h: (i, 0)),
                  pl.BlockSpec((1, D), lambda i, h: (0, 0)),
                  pl.BlockSpec((1, D), lambda i, h: (0, 0))],
        out_specs=pl.BlockSpec((tm, D), lambda i, h: (i, 0)),
        scratch_shapes=[pltpu.VMEM((tm, D), jnp.float32)],
        compiler_params=pltpu.CompilerParams(
            dimension_semantics=("parallel", "arbitrary"),
            vmem_limit_bytes=_VMEM_LIMIT),
    )(attn, wo_hm, bo.reshape(1, D), residual,
      gamma.reshape(1, D), beta.reshape(1, D))


# ----------------------------- fused FFN (up + ReLU + down) + residual + LayerNorm -----------------------------
# Grid over (M tiles, d_ff tiles): per step h = relu(x @ w1[:, f] + b1[f]) is kept
# in VMEM/vregs and immediately contracted into the (tm, D) accumulator with
# w2[f, :], so the (M, d_ff) intermediate never hits HBM.

def _ffn_addln_kernel(x_ref, w1_ref, b1_ref, w2_ref, b2_ref, g_ref, bt_ref,
                      o_ref, acc_ref, *, eps):
    f = pl.program_id(1)

    @pl.when(f == 0)
    def _():
        acc_ref[...] = jnp.zeros_like(acc_ref)

    h = jnp.dot(x_ref[...], w1_ref[...], preferred_element_type=jnp.float32)
    h = jnp.maximum(h + b1_ref[...], 0.0)
    acc_ref[...] += jnp.dot(h.astype(w2_ref.dtype), w2_ref[...],
                            preferred_element_type=jnp.float32)

    @pl.when(f == pl.num_programs(1) - 1)
    def _():
        y = acc_ref[...] + b2_ref[...] + x_ref[...].astype(jnp.float32)
        mu = jnp.mean(y, axis=-1, keepdims=True)
        yc = y - mu
        var = jnp.mean(yc * yc, axis=-1, keepdims=True)
        inv = jax.lax.rsqrt(var + eps)
        o_ref[...] = (yc * inv * g_ref[...] + bt_ref[...]).astype(o_ref.dtype)


def pallas_ffn_add_layernorm(x, w1, b1, w2, b2, gamma, beta, eps=1e-5,
                             tm=256, tff=512):
    M, D = x.shape
    FF = w1.shape[1]
    tm = _pick_tile(M, tm, 8)
    tff = _pick_tile(FF, tff, 128)
    return pl.pallas_call(
        functools.partial(_ffn_addln_kernel, eps=eps),
        out_shape=jax.ShapeDtypeStruct((M, D), _ACT_DTYPE),
        grid=(M // tm, FF // tff),
        in_specs=[pl.BlockSpec((tm, D), lambda i, f: (i, 0)),
                  pl.BlockSpec((D, tff), lambda i, f: (0, f)),
                  pl.BlockSpec((1, tff), lambda i, f: (0, f)),
                  pl.BlockSpec((tff, D), lambda i, f: (f, 0)),
                  pl.BlockSpec((1, D), lambda i, f: (0, 0)),
                  pl.BlockSpec((1, D), lambda i, f: (0, 0)),
                  pl.BlockSpec((1, D), lambda i, f: (0, 0))],
        out_specs=pl.BlockSpec((tm, D), lambda i, f: (i, 0)),
        scratch_shapes=[pltpu.VMEM((tm, D), jnp.float32)],
        compiler_params=pltpu.CompilerParams(
            dimension_semantics=("parallel", "arbitrary"),
            vmem_limit_bytes=_VMEM_LIMIT),
    )(x, w1, b1.reshape(1, FF), w2, b2.reshape(1, D),
      gamma.reshape(1, D), beta.reshape(1, D))


# ----------------------------- model glue -----------------------------

def init_params(key, vocab, max_len, d_model, n_heads, d_ff, n_layers):
    d_head = d_model // n_heads
    attn_scale = 1.0 / math.sqrt(d_head)
    keys = jax.random.split(key, 2 + 6 * n_layers)
    p = {
        "tok_emb": (0.02 * jax.random.normal(keys[0], (vocab, d_model))).astype(_WEIGHT_DTYPE),
        "pos_emb": (0.02 * jax.random.normal(keys[1], (max_len, d_model))).astype(_WEIGHT_DTYPE),
        "layers": [],
    }
    for l in range(n_layers):
        kq, kk, kv, ko, k1, k2 = keys[2 + 6 * l: 2 + 6 * (l + 1)]
        s = 1.0 / math.sqrt(d_model)
        wq = s * jax.random.normal(kq, (d_model, d_model), jnp.float32)
        wk = s * jax.random.normal(kk, (d_model, d_model), jnp.float32)
        wv = s * jax.random.normal(kv, (d_model, d_model), jnp.float32)
        wo = s * jax.random.normal(ko, (d_model, d_model), jnp.float32)
        bq = jnp.zeros((d_model,), jnp.float32)
        bk = jnp.zeros((d_model,), jnp.float32)
        bv = jnp.zeros((d_model,), jnp.float32)
        lp = {
            # Fused Q|K|V weight/bias; the softmax scale 1/sqrt(Dh) is folded
            # into the Q columns so the attention kernel has no scale multiply.
            "wqkv": jnp.concatenate([wq * attn_scale, wk, wv], axis=1).astype(_WEIGHT_DTYPE),
            "bqkv": jnp.concatenate([bq * attn_scale, bk, bv], axis=0),
            # wo stored head-major (H, Dh, D) to match the attention output layout.
            "wo_hm": wo.reshape(n_heads, d_head, d_model).astype(_WEIGHT_DTYPE),
            "bo": jnp.zeros((d_model,), jnp.float32),
            "w1": (s * jax.random.normal(k1, (d_model, d_ff))).astype(_WEIGHT_DTYPE),
            "b1": jnp.zeros((d_ff,), jnp.float32),
            "w2": ((1.0 / math.sqrt(d_ff)) *
                   jax.random.normal(k2, (d_ff, d_model))).astype(_WEIGHT_DTYPE),
            "b2": jnp.zeros((d_model,), jnp.float32),
            "ln1_g": jnp.ones((d_model,), jnp.float32),
            "ln1_b": jnp.zeros((d_model,), jnp.float32),
            "ln2_g": jnp.ones((d_model,), jnp.float32),
            "ln2_b": jnp.zeros((d_model,), jnp.float32),
        }
        p["layers"].append(lp)
    return p


def transformer_block(lp, out, mask, B, S, n_heads):
    M, D = out.shape
    Dh = D // n_heads
    # Fused QKV projection -> head-major (H, M, Dh) each; reshape to (H, B, S, Dh) is free.
    q, k, v = pallas_qkv_proj(out, lp["wqkv"], lp["bqkv"], n_heads, Dh)
    attn = pallas_flash_attention(q.reshape(n_heads, B, S, Dh),
                                  k.reshape(n_heads, B, S, Dh),
                                  v.reshape(n_heads, B, S, Dh),
                                  mask)                       # (H, B, S, Dh)
    attn = attn.reshape(n_heads, M, Dh)                        # free reshape
    # Output projection (head-major lhs) fused with residual add + LayerNorm.
    x1 = pallas_wo_add_layernorm(attn, lp["wo_hm"], lp["bo"], out,
                                 lp["ln1_g"], lp["ln1_b"])
    # Fused FFN (up + ReLU + down) + residual add + LayerNorm.
    x2 = pallas_ffn_add_layernorm(x1, lp["w1"], lp["b1"], lp["w2"], lp["b2"],
                                  lp["ln2_g"], lp["ln2_b"])
    return x2


@functools.partial(jax.jit, static_argnums=(3,))
def encoder_forward(params, x_tokens, mask, n_heads):
    # x_tokens: (B, S) int32 token ids; mask: (B, 1, S) additive float mask.
    B, S = x_tokens.shape
    D = params["tok_emb"].shape[1]
    tok = params["tok_emb"][x_tokens]                  # gather stays in XLA
    x = pallas_embed_add(tok, params["pos_emb"][:S])   # (B, S, D) bf16
    # TODO(synk): nn.Dropout is evaluated in eval mode (identity); training-mode
    # stochastic dropout (pltpu.prng_*) is not implemented here.
    out = x.reshape(B * S, D)
    for lp in params["layers"]:
        out = transformer_block(lp, out, mask, B, S, n_heads)
    return out.reshape(B, S, D)


# ----------------------------- main -----------------------------

if __name__ == "__main__":
    B, S, D, H, FF, VOCAB, LAYERS = 2, 16, 128, 4, 256, 32, 2

    params = init_params(jax.random.PRNGKey(1), VOCAB, S, D, H, FF, LAYERS)

    key = jax.random.PRNGKey(0)
    k_tok, _ = jax.random.split(key)
    x_tokens = jax.random.randint(k_tok, (B, S), 0, VOCAB, dtype=jnp.int32)

    # Padding key-mask: batch 0 fully valid, batch 1 valid for first 12 tokens.
    lengths = jnp.array([S, 12], dtype=jnp.int32)
    valid = (jnp.arange(S)[None, :] < lengths[:, None])                  # (B, S) bool
    mask = jnp.where(valid, 0.0, -1e9).astype(jnp.float32)[:, None, :]   # (B, 1, S)

    out = encoder_forward(params, x_tokens, mask, H)
    out = jax.block_until_ready(out)
    assert out.shape == (B, S, D)
    assert bool(jnp.all(jnp.isfinite(out.astype(jnp.float32))))
    print("KERNEL_OK")
</pallas_src>

<mosaic_0001>
module attributes {stable_mosaic.version = 11 : i64} {
  func.func @_embed_add_kernel(%arg0: i32, %arg1: i32, %arg2: memref<1x16x128xbf16, #tpu.memory_space<vmem>>, %arg3: memref<16x128xbf16, #tpu.memory_space<vmem>>, %arg4: memref<1x16x128xbf16, #tpu.memory_space<vmem>>) attributes {dimension_semantics = [#tpu.dimension_semantics<parallel>, #tpu.dimension_semantics<parallel>], iteration_bounds = array<i64: 2, 1>, scalar_prefetch = 0 : i64, scratch_operands = 0 : i64, tpu.core_type = #tpu.core_type<tc>, window_params = [{transform_indices = @transform_0, window_bounds = array<i64: 1, 16, 128>}, {transform_indices = @transform_1, window_bounds = array<i64: 16, 128>}, {transform_indices = @transform_2, window_bounds = array<i64: 1, 16, 128>}]} {
    %c0 = arith.constant 0 : index
    %c0_0 = arith.constant 0 : index
    %c0_1 = arith.constant 0 : index
    %0 = vector.load %arg2[%c0, %c0_0, %c0_1] : memref<1x16x128xbf16, #tpu.memory_space<vmem>>, vector<1x16x128xbf16>
    %1 = arith.extf %0 : vector<1x16x128xbf16> to vector<1x16x128xf32>
    %c0_2 = arith.constant 0 : index
    %c0_3 = arith.constant 0 : index
    %2 = vector.load %arg3[%c0_2, %c0_3] : memref<16x128xbf16, #tpu.memory_space<vmem>>, vector<16x128xbf16>
    %3 = arith.extf %2 : vector<16x128xbf16> to vector<16x128xf32>
    %4 = vector.shape_cast %3 : vector<16x128xf32> to vector<1x16x128xf32>
    %5 = arith.addf %1, %4 : vector<1x16x128xf32>
    %6 = arith.truncf %5 : vector<1x16x128xf32> to vector<1x16x128xbf16>
    %c0_4 = arith.constant 0 : index
    %c0_5 = arith.constant 0 : index
    %c0_6 = arith.constant 0 : index
    %7 = vector.load %arg4[%c0_4, %c0_5, %c0_6] : memref<1x16x128xbf16, #tpu.memory_space<vmem>>, vector<1x16x128xbf16>
    tpu.vector_store %arg4[%c0_4, %c0_5, %c0_6], %6 {strides = array<i32>} : memref<1x16x128xbf16, #tpu.memory_space<vmem>>, vector<1x16x128xbf16>,
    return
  }
  func.func @transform_0(%arg0: i32, %arg1: i32) -> (i32, i32, i32) {
    %c0_i32 = arith.constant 0 : i32
    %c0_i32_0 = arith.constant 0 : i32
    return %arg0, %arg1, %c0_i32 : i32, i32, i32
  }
  func.func @transform_1(%arg0: i32, %arg1: i32) -> (i32, i32) {
    %c0_i32 = arith.constant 0 : i32
    %c0_i32_0 = arith.constant 0 : i32
    return %arg1, %c0_i32 : i32, i32
  }
  func.func @transform_2(%arg0: i32, %arg1: i32) -> (i32, i32, i32) {
    %c0_i32 = arith.constant 0 : i32
    %c0_i32_0 = arith.constant 0 : i32
    return %arg0, %arg1, %c0_i32 : i32, i32, i32
  }
}

module attributes {stable_mosaic.version = 11 : i64} {
  func.func @_flash_attn_kernel(%arg0: i32, %arg1: i32, %arg2: i32, %arg3: i32, %arg4: memref<1x1x16x32xbf16, #tpu.memory_space<vmem>>, %arg5: memref<1x1x16x32xbf16, #tpu.memory_space<vmem>>, %arg6: memref<1x1x16x32xbf16, #tpu.memory_space<vmem>>, %arg7: memref<1x1x16xf32, #tpu.memory_space<vmem>>, %arg8: memref<1x1x16x32xbf16, #tpu.memory_space<vmem>>, %arg9: memref<16x1xf32, #tpu.memory_space<vmem>>, %arg10: memref<16x1xf32, #tpu.memory_space<vmem>>, %arg11: memref<16x32xf32, #tpu.memory_space<vmem>>) attributes {dimension_semantics = [#tpu.dimension_semantics<parallel>, #tpu.dimension_semantics<parallel>, #tpu.dimension_semantics<parallel>, #tpu.dimension_semantics<arbitrary>], iteration_bounds = array<i64: 4, 2, 1, 1>, scalar_prefetch = 0 : i64, scratch_operands = 3 : i64, tpu.core_type = #tpu.core_type<tc>, window_params = [{transform_indices = @transform_0, window_bounds = array<i64: 1, 1, 16, 32>}, {transform_indices = @transform_1, window_bounds = array<i64: 1, 1, 16, 32>}, {transform_indices = @transform_2, window_bounds = array<i64: 1, 1, 16, 32>}, {transform_indices = @transform_3, window_bounds = array<i64: 1, 1, 16>}, {transform_indices = @transform_4, window_bounds = array<i64: 1, 1, 16, 32>}]} {
    %c0_i32 = arith.constant 0 : i32
    %0 = arith.cmpi eq, %arg3, %c0_i32 : i32
    %1 = arith.extui %0 : i1 to i32
    %c0_i32_0 = arith.constant 0 : i32
    %2 = arith.cmpi ne, %1, %c0_i32_0 : i32
    scf.if %2 {
      %cst_34 = arith.constant -1.000000e+30 : f32
      %41 = vector.broadcast %cst_34 : f32 to vector<16x1xf32>
      %c0_35 = arith.constant 0 : index
      %c0_36 = arith.constant 0 : index
      %42 = vector.load %arg9[%c0_35, %c0_36] : memref<16x1xf32, #tpu.memory_space<vmem>>, vector<16x1xf32>
      tpu.vector_store %arg9[%c0_35, %c0_36], %41 {strides = array<i32>} : memref<16x1xf32, #tpu.memory_space<vmem>>, vector<16x1xf32>,
      %cst_37 = arith.constant 0.000000e+00 : f32
      %43 = vector.broadcast %cst_37 : f32 to vector<16x1xf32>
      %c0_38 = arith.constant 0 : index
      %c0_39 = arith.constant 0 : index
      %44 = vector.load %arg10[%c0_38, %c0_39] : memref<16x1xf32, #tpu.memory_space<vmem>>, vector<16x1xf32>
      tpu.vector_store %arg10[%c0_38, %c0_39], %43 {strides = array<i32>} : memref<16x1xf32, #tpu.memory_space<vmem>>, vector<16x1xf32>,
      %cst_40 = arith.constant 0.000000e+00 : f32
      %45 = vector.broadcast %cst_40 : f32 to vector<16x32xf32>
      %c0_41 = arith.constant 0 : index
      %c0_42 = arith.constant 0 : index
      %46 = vector.load %arg11[%c0_41, %c0_42] : memref<16x32xf32, #tpu.memory_space<vmem>>, vector<16x32xf32>
      tpu.vector_store %arg11[%c0_41, %c0_42], %45 {strides = array<i32>} : memref<16x32xf32, #tpu.memory_space<vmem>>, vector<16x32xf32>,
    } else {
    }
    %c0 = arith.constant 0 : index
    %c0_1 = arith.constant 0 : index
    %c0_2 = arith.constant 0 : index
    %c0_3 = arith.constant 0 : index
    %3 = vector.load %arg4[%c0, %c0_1, %c0_2, %c0_3] : memref<1x1x16x32xbf16, #tpu.memory_space<vmem>>, vector<1x1x16x32xbf16>
    %4 = vector.shape_cast %3 : vector<1x1x16x32xbf16> to vector<16x32xbf16>
    %c0_4 = arith.constant 0 : index
    %c0_5 = arith.constant 0 : index
    %c0_6 = arith.constant 0 : index
    %c0_7 = arith.constant 0 : index
    %5 = vector.load %arg5[%c0_4, %c0_5, %c0_6, %c0_7] : memref<1x1x16x32xbf16, #tpu.memory_space<vmem>>, vector<1x1x16x32xbf16>
    %6 = vector.shape_cast %5 : vector<1x1x16x32xbf16> to vector<16x32xbf16>
    %c0_8 = arith.constant 0 : index
    %c0_9 = arith.constant 0 : index
    %c0_10 = arith.constant 0 : index
    %c0_11 = arith.constant 0 : index
    %7 = vector.load %arg6[%c0_8, %c0_9, %c0_10, %c0_11] : memref<1x1x16x32xbf16, #tpu.memory_space<vmem>>, vector<1x1x16x32xbf16>
    %8 = vector.shape_cast %7 : vector<1x1x16x32xbf16> to vector<16x32xbf16>
    %cst = arith.constant dense<0.000000e+00> : vector<16x16xf32>
    %9 = tpu.matmul %4, %6, %cst {dimension_numbers = #tpu.dot_dimension_numbers<[1], [1], [0], [0], [0, 0, 1, 0], [], []>} : vector<16x32xbf16>, vector<16x32xbf16>, vector<16x16xf32> -> vector<16x16xf32>
    %c0_12 = arith.constant 0 : index
    %c0_13 = arith.constant 0 : index
    %c0_14 = arith.constant 0 : index
    %10 = vector.load %arg7[%c0_12, %c0_13, %c0_14] : memref<1x1x16xf32, #tpu.memory_space<vmem>>, vector<1x1x16xf32>
    %11 = vector.shape_cast %10 : vector<1x1x16xf32> to vector<1x16xf32>
    %12 = vector.broadcast %11 : vector<1x16xf32> to vector<16x16xf32>
    %13 = arith.addf %9, %12 : vector<16x16xf32>
    %c0_15 = arith.constant 0 : index
    %c0_16 = arith.constant 0 : index
    %14 = vector.load %arg9[%c0_15, %c0_16] : memref<16x1xf32, #tpu.memory_space<vmem>>, vector<16x1xf32>
    %cst_17 = arith.constant dense<0xFF800000> : vector<16xf32>
    %15 = vector.multi_reduction <maximumf>, %13, %cst_17 [1] : vector<16x16xf32> to vector<16xf32>
    %16 = vector.shape_cast %15 : vector<16xf32> to vector<16x1xf32>
    %17 = arith.maximumf %14, %16 : vector<16x1xf32>
    %c0_18 = arith.constant 0 : index
    %c0_19 = arith.constant 0 : index
    %18 = vector.load %arg9[%c0_18, %c0_19] : memref<16x1xf32, #tpu.memory_space<vmem>>, vector<16x1xf32>
    %19 = arith.subf %18, %17 : vector<16x1xf32>
    %20 = math.exp %19 : vector<16x1xf32>
    %21 = vector.broadcast %17 : vector<16x1xf32> to vector<16x16xf32>
    %22 = arith.subf %13, %21 : vector<16x16xf32>
    %23 = math.exp %22 : vector<16x16xf32>
    %c0_20 = arith.constant 0 : index
    %c0_21 = arith.constant 0 : index
    %24 = vector.load %arg10[%c0_20, %c0_21] : memref<16x1xf32, #tpu.memory_space<vmem>>, vector<16x1xf32>
    %25 = arith.mulf %20, %24 : vector<16x1xf32>
    %cst_22 = arith.constant dense<0.000000e+00> : vector<16xf32>
    %26 = vector.multi_reduction <add>, %23, %cst_22 [1] : vector<16x16xf32> to vector<16xf32>
    %27 = vector.shape_cast %26 : vector<16xf32> to vector<16x1xf32>
    %28 = arith.addf %25, %27 : vector<16x1xf32>
    %c0_23 = arith.constant 0 : index
    %c0_24 = arith.constant 0 : index
    %29 = vector.load %arg10[%c0_23, %c0_24] : memref<16x1xf32, #tpu.memory_space<vmem>>, vector<16x1xf32>
    tpu.vector_store %arg10[%c0_23, %c0_24], %28 {strides = array<i32>} : memref<16x1xf32, #tpu.memory_space<vmem>>, vector<16x1xf32>,
    %c0_25 = arith.constant 0 : index
    %c0_26 = arith.constant 0 : index
    %30 = vector.load %arg11[%c0_25, %c0_26] : memref<16x32xf32, #tpu.memory_space<vmem>>, vector<16x32xf32>
    %31 = vector.broadcast %20 : vector<16x1xf32> to vector<16x32xf32>
    %32 = arith.mulf %31, %30 : vector<16x32xf32>
    %33 = arith.truncf %23 : vector<16x16xf32> to vector<16x16xbf16>
    %cst_27 = arith.constant dense<0.000000e+00> : vector<16x32xf32>
    %34 = tpu.matmul %33, %8, %cst_27 {dimension_numbers = #tpu.dot_dimension_numbers<[1], [0], [0], [1], [0, 0, 1, 1], [], []>} : vector<16x16xbf16>, vector<16x32xbf16>, vector<16x32xf32> -> vector<16x32xf32>
    %35 = arith.addf %32, %34 : vector<16x32xf32>
    %c0_28 = arith.constant 0 : index
    %c0_29 = arith.constant 0 : index
    %36 = vector.load %arg11[%c0_28, %c0_29] : memref<16x32xf32, #tpu.memory_space<vmem>>, vector<16x32xf32>
    tpu.vector_store %arg11[%c0_28, %c0_29], %35 {strides = array<i32>} : memref<16x32xf32, #tpu.memory_space<vmem>>, vector<16x32xf32>,
    %c0_30 = arith.constant 0 : index
    %c0_31 = arith.constant 0 : index
    %37 = vector.load %arg9[%c0_30, %c0_31] : memref<16x1xf32, #tpu.memory_space<vmem>>, vector<16x1xf32>
    tpu.vector_store %arg9[%c0_30, %c0_31], %17 {strides = array<i32>} : memref<16x1xf32, #tpu.memory_space<vmem>>, vector<16x1xf32>,
    %c0_i32_32 = arith.constant 0 : i32
    %38 = arith.cmpi eq, %arg3, %c0_i32_32 : i32
    %39 = arith.extui %38 : i1 to i32
    %c0_i32_33 = arith.constant 0 : i32
    %40 = arith.cmpi ne, %39, %c0_i32_33 : i32
    scf.if %40 {
      %c0_34 = arith.constant 0 : index
      %c0_35 = arith.constant 0 : index
      %41 = vector.load %arg11[%c0_34, %c0_35] : memref<16x32xf32, #tpu.memory_space<vmem>>, vector<16x32xf32>
      %c0_36 = arith.constant 0 : index
      %c0_37 = arith.constant 0 : index
      %42 = vector.load %arg10[%c0_36, %c0_37] : memref<16x1xf32, #tpu.memory_space<vmem>>, vector<16x1xf32>
      %43 = tpu.reciprocal %42 {approx = true} : vector<16x1xf32> -> vector<16x1xf32>
      %44 = vector.broadcast %43 : vector<16x1xf32> to vector<16x32xf32>
      %45 = arith.mulf %41, %44 : vector<16x32xf32>
      %46 = arith.truncf %45 : vector<16x32xf32> to vector<16x32xbf16>
      %c0_38 = arith.constant 0 : index
      %c0_39 = arith.constant 0 : index
      %c0_40 = arith.constant 0 : index
      %c0_41 = arith.constant 0 : index
      %47 = vector.load %arg8[%c0_38, %c0_39, %c0_40, %c0_41] : memref<1x1x16x32xbf16, #tpu.memory_space<vmem>>, vector<1x1x16x32xbf16>
      %48 = vector.shape_cast %47 : vector<1x1x16x32xbf16> to vector<16x32xbf16>
      %49 = vector.shape_cast %46 : vector<16x32xbf16> to vector<1x1x16x32xbf16>
      tpu.vector_store %arg8[%c0_38, %c0_39, %c0_40, %c0_41], %49 {strides = array<i32>} : memref<1x1x16x32xbf16, #tpu.memory_space<vmem>>, vector<1x1x16x32xbf16>,
    } else {
    }
    return
  }
  func.func @transform_0(%arg0: i32, %arg1: i32, %arg2: i32, %arg3: i32) -> (i32, i32, i32, i32) {
    %c0_i32 = arith.constant 0 : i32
    %c0_i32_0 = arith.constant 0 : i32
    return %arg0, %arg1, %arg2, %c0_i32 : i32, i32, i32, i32
  }
  func.func @transform_1(%arg0: i32, %arg1: i32, %arg2: i32, %arg3: i32) -> (i32, i32, i32, i32) {
    %c0_i32 = arith.constant 0 : i32
    %c0_i32_0 = arith.constant 0 : i32
    return %arg0, %arg1, %arg3, %c0_i32 : i32, i32, i32, i32
  }
  func.func @transform_2(%arg0: i32, %arg1: i32, %arg2: i32, %arg3: i32) -> (i32, i32, i32, i32) {
    %c0_i32 = arith.constant 0 : i32
    %c0_i32_0 = arith.constant 0 : i32
    return %arg0, %arg1, %arg3, %c0_i32 : i32, i32, i32, i32
  }
  func.func @transform_3(%arg0: i32, %arg1: i32, %arg2: i32, %arg3: i32) -> (i32, i32, i32) {
    %c0_i32 = arith.constant 0 : i32
    %c0_i32_0 = arith.constant 0 : i32
    return %arg1, %c0_i32, %arg3 : i32, i32, i32
  }
  func.func @transform_4(%arg0: i32, %arg1: i32, %arg2: i32, %arg3: i32) -> (i32, i32, i32, i32) {
    %c0_i32 = arith.constant 0 : i32
    %c0_i32_0 = arith.constant 0 : i32
    return %arg0, %arg1, %arg2, %c0_i32 : i32, i32, i32, i32
  }
}

module attributes {stable_mosaic.version = 11 : i64} {
  func.func @_wo_addln_kernel(%arg0: i32, %arg1: i32, %arg2: memref<1x32x32xbf16, #tpu.memory_space<vmem>>, %arg3: memref<1x32x128xbf16, #tpu.memory_space<vmem>>, %arg4: memref<1x128xf32, #tpu.memory_space<vmem>>, %arg5: memref<32x128xbf16, #tpu.memory_space<vmem>>, %arg6: memref<1x128xf32, #tpu.memory_space<vmem>>, %arg7: memref<1x128xf32, #tpu.memory_space<vmem>>, %arg8: memref<32x128xbf16, #tpu.memory_space<vmem>>, %arg9: memref<32x128xf32, #tpu.memory_space<vmem>>) attributes {dimension_semantics = [#tpu.dimension_semantics<parallel>, #tpu.dimension_semantics<arbitrary>], iteration_bounds = array<i64: 1, 4>, scalar_prefetch = 0 : i64, scratch_operands = 1 : i64, tpu.core_type = #tpu.core_type<tc>, window_params = [{transform_indices = @transform_0, window_bounds = array<i64: 1, 32, 32>}, {transform_indices = @transform_1, window_bounds = array<i64: 1, 32, 128>}, {pipeline_mode = #tpu.pipeline_mode<synchronous>, transform_indices = @transform_2, window_bounds = array<i64: 1, 128>}, {transform_indices = @transform_3, window_bounds = array<i64: 32, 128>}, {pipeline_mode = #tpu.pipeline_mode<synchronous>, transform_indices = @transform_4, window_bounds = array<i64: 1, 128>}, {pipeline_mode = #tpu.pipeline_mode<synchronous>, transform_indices = @transform_5, window_bounds = array<i64: 1, 128>}, {transform_indices = @transform_6, window_bounds = array<i64: 32, 128>}]} {
    %c0_i32 = arith.constant 0 : i32
    %0 = arith.cmpi eq, %arg1, %c0_i32 : i32
    %1 = arith.extui %0 : i1 to i32
    %c0_i32_0 = arith.constant 0 : i32
    %2 = arith.cmpi ne, %1, %c0_i32_0 : i32
    scf.if %2 {
      %cst_11 = arith.constant 0.000000e+00 : f32
      %14 = vector.broadcast %cst_11 : f32 to vector<32x128xf32>
      %c0_12 = arith.constant 0 : index
      %c0_13 = arith.constant 0 : index
      %15 = vector.load %arg9[%c0_12, %c0_13] : memref<32x128xf32, #tpu.memory_space<vmem>>, vector<32x128xf32>
      tpu.vector_store %arg9[%c0_12, %c0_13], %14 {strides = array<i32>} : memref<32x128xf32, #tpu.memory_space<vmem>>, vector<32x128xf32>,
    } else {
    }
    %c0 = arith.constant 0 : index
    %c0_1 = arith.constant 0 : index
    %3 = vector.load %arg9[%c0, %c0_1] : memref<32x128xf32, #tpu.memory_space<vmem>>, vector<32x128xf32>
    %c0_2 = arith.constant 0 : index
    %c0_3 = arith.constant 0 : index
    %c0_4 = arith.constant 0 : index
    %4 = vector.load %arg2[%c0_2, %c0_3, %c0_4] : memref<1x32x32xbf16, #tpu.memory_space<vmem>>, vector<1x32x32xbf16>
    %5 = vector.shape_cast %4 : vector<1x32x32xbf16> to vector<32x32xbf16>
    %c0_5 = arith.constant 0 : index
    %c0_6 = arith.constant 0 : index
    %c0_7 = arith.constant 0 : index
    %6 = vector.load %arg3[%c0_5, %c0_6, %c0_7] : memref<1x32x128xbf16, #tpu.memory_space<vmem>>, vector<1x32x128xbf16>
    %7 = vector.shape_cast %6 : vector<1x32x128xbf16> to vector<32x128xbf16>
    %cst = arith.constant dense<0.000000e+00> : vector<32x128xf32>
    %8 = tpu.matmul %5, %7, %cst {dimension_numbers = #tpu.dot_dimension_numbers<[1], [0], [0], [1], [0, 0, 1, 1], [], []>} : vector<32x32xbf16>, vector<32x128xbf16>, vector<32x128xf32> -> vector<32x128xf32>
    %9 = arith.addf %3, %8 : vector<32x128xf32>
    %c0_8 = arith.constant 0 : index
    %c0_9 = arith.constant 0 : index
    %10 = vector.load %arg9[%c0_8, %c0_9] : memref<32x128xf32, #tpu.memory_space<vmem>>, vector<32x128xf32>
    tpu.vector_store %arg9[%c0_8, %c0_9], %9 {strides = array<i32>} : memref<32x128xf32, #tpu.memory_space<vmem>>, vector<32x128xf32>,
    %c3_i32 = arith.constant 3 : i32
    %11 = arith.cmpi eq, %arg1, %c3_i32 : i32
    %12 = arith.extui %11 : i1 to i32
    %c0_i32_10 = arith.constant 0 : i32
    %13 = arith.cmpi ne, %12, %c0_i32_10 : i32
    scf.if %13 {
      %c0_11 = arith.constant 0 : index
      %c0_12 = arith.constant 0 : index
      %14 = vector.load %arg9[%c0_11, %c0_12] : memref<32x128xf32, #tpu.memory_space<vmem>>, vector<32x128xf32>
      %c0_13 = arith.constant 0 : index
      %c0_14 = arith.constant 0 : index
      %15 = vector.load %arg4[%c0_13, %c0_14] : memref<1x128xf32, #tpu.memory_space<vmem>>, vector<1x128xf32>
      %16 = vector.broadcast %15 : vector<1x128xf32> to vector<32x128xf32>
      %17 = arith.addf %14, %16 : vector<32x128xf32>
      %c0_15 = arith.constant 0 : index
      %c0_16 = arith.constant 0 : index
      %18 = vector.load %arg5[%c0_15, %c0_16] : memref<32x128xbf16, #tpu.memory_space<vmem>>, vector<32x128xbf16>
      %19 = arith.extf %18 : vector<32x128xbf16> to vector<32x128xf32>
      %20 = arith.addf %17, %19 : vector<32x128xf32>
      %cst_17 = arith.constant dense<0.000000e+00> : vector<32xf32>
      %21 = vector.multi_reduction <add>, %20, %cst_17 [1] : vector<32x128xf32> to vector<32xf32>
      %22 = vector.shape_cast %21 : vector<32xf32> to vector<32x1xf32>
      %cst_18 = arith.constant 1.280000e+02 : f32
      %23 = vector.broadcast %cst_18 : f32 to vector<32x1xf32>
      %24 = arith.divf %22, %23 : vector<32x1xf32>
      %25 = vector.broadcast %24 : vector<32x1xf32> to vector<32x128xf32>
      %26 = arith.subf %20, %25 : vector<32x128xf32>
      %27 = arith.mulf %26, %26 : vector<32x128xf32>
      %cst_19 = arith.constant dense<0.000000e+00> : vector<32xf32>
      %28 = vector.multi_reduction <add>, %27, %cst_19 [1] : vector<32x128xf32> to vector<32xf32>
      %29 = vector.shape_cast %28 : vector<32xf32> to vector<32x1xf32>
      %cst_20 = arith.constant 1.280000e+02 : f32
      %30 = vector.broadcast %cst_20 : f32 to vector<32x1xf32>
      %31 = arith.divf %29, %30 : vector<32x1xf32>
      %cst_21 = arith.constant 9.99999974E-6 : f32
      %32 = vector.broadcast %cst_21 : f32 to vector<32x1xf32>
      %33 = arith.addf %31, %32 : vector<32x1xf32>
      %34 = math.rsqrt %33 : vector<32x1xf32>
      %35 = vector.broadcast %34 : vector<32x1xf32> to vector<32x128xf32>
      %36 = arith.mulf %26, %35 : vector<32x128xf32>
      %c0_22 = arith.constant 0 : index
      %c0_23 = arith.constant 0 : index
      %37 = vector.load %arg6[%c0_22, %c0_23] : memref<1x128xf32, #tpu.memory_space<vmem>>, vector<1x128xf32>
      %38 = vector.broadcast %37 : vector<1x128xf32> to vector<32x128xf32>
      %39 = arith.mulf %36, %38 : vector<32x128xf32>
      %c0_24 = arith.constant 0 : index
      %c0_25 = arith.constant 0 : index
      %40 = vector.load %arg7[%c0_24, %c0_25] : memref<1x128xf32, #tpu.memory_space<vmem>>, vector<1x128xf32>
      %41 = vector.broadcast %40 : vector<1x128xf32> to vector<32x128xf32>
      %42 = arith.addf %39, %41 : vector<32x128xf32>
      %43 = arith.truncf %42 : vector<32x128xf32> to vector<32x128xbf16>
      %c0_26 = arith.constant 0 : index
      %c0_27 = arith.constant 0 : index
      %44 = vector.load %arg8[%c0_26, %c0_27] : memref<32x128xbf16, #tpu.memory_space<vmem>>, vector<32x128xbf16>
      tpu.vector_store %arg8[%c0_26, %c0_27], %43 {strides = array<i32>} : memref<32x128xbf16, #tpu.memory_space<vmem>>, vector<32x128xbf16>,
    } else {
    }
    return
  }
  func.func @transform_0(%arg0: i32, %arg1: i32) -> (i32, i32, i32) {
    %c0_i32 = arith.constant 0 : i32
    %c0_i32_0 = arith.constant 0 : i32
    return %arg1, %arg0, %c0_i32 : i32, i32, i32
  }
  func.func @transform_1(%arg0: i32, %arg1: i32) -> (i32, i32, i32) {
    %c0_i32 = arith.constant 0 : i32
    %c0_i32_0 = arith.constant 0 : i32
    %c0_i32_1 = arith.constant 0 : i32
    return %arg1, %c0_i32, %c0_i32_0 : i32, i32, i32
  }
  func.func @transform_2(%arg0: i32, %arg1: i32) -> (i32, i32) {
    %c0_i32 = arith.constant 0 : i32
    %c0_i32_0 = arith.constant 0 : i32
    %c0_i32_1 = arith.constant 0 : i32
    return %c0_i32, %c0_i32_0 : i32, i32
  }
  func.func @transform_3(%arg0: i32, %arg1: i32) -> (i32, i32) {
    %c0_i32 = arith.constant 0 : i32
    %c0_i32_0 = arith.constant 0 : i32
    return %arg0, %c0_i32 : i32, i32
  }
  func.func @transform_4(%arg0: i32, %arg1: i32) -> (i32, i32) {
    %c0_i32 = arith.constant 0 : i32
    %c0_i32_0 = arith.constant 0 : i32
    %c0_i32_1 = arith.constant 0 : i32
    return %c0_i32, %c0_i32_0 : i32, i32
  }
  func.func @transform_5(%arg0: i32, %arg1: i32) -> (i32, i32) {
    %c0_i32 = arith.constant 0 : i32
    %c0_i32_0 = arith.constant 0 : i32
    %c0_i32_1 = arith.constant 0 : i32
    return %c0_i32, %c0_i32_0 : i32, i32
  }
  func.func @transform_6(%arg0: i32, %arg1: i32) -> (i32, i32) {
    %c0_i32 = arith.constant 0 : i32
    %c0_i32_0 = arith.constant 0 : i32
    return %arg0, %c0_i32 : i32, i32
  }
}

module attributes {stable_mosaic.version = 11 : i64} {
  func.func @_qkv_kernel(%arg0: i32, %arg1: i32, %arg2: memref<32x128xbf16, #tpu.memory_space<vmem>>, %arg3: memref<128x384xbf16, #tpu.memory_space<vmem>>, %arg4: memref<1x384xf32, #tpu.memory_space<vmem>>, %arg5: memref<4x32x32xbf16, #tpu.memory_space<vmem>>, %arg6: memref<4x32x32xbf16, #tpu.memory_space<vmem>>, %arg7: memref<4x32x32xbf16, #tpu.memory_space<vmem>>, %arg8: memref<32x384xf32, #tpu.memory_space<vmem>>) attributes {dimension_semantics = [#tpu.dimension_semantics<parallel>, #tpu.dimension_semantics<arbitrary>], iteration_bounds = array<i64: 1, 1>, scalar_prefetch = 0 : i64, scratch_operands = 1 : i64, tpu.core_type = #tpu.core_type<tc>, window_params = [{transform_indices = @transform_0, window_bounds = array<i64: 32, 128>}, {transform_indices = @transform_1, window_bounds = array<i64: 128, 384>}, {pipeline_mode = #tpu.pipeline_mode<synchronous>, transform_indices = @transform_2, window_bounds = array<i64: 1, 384>}, {transform_indices = @transform_3, window_bounds = array<i64: 4, 32, 32>}, {transform_indices = @transform_4, window_bounds = array<i64: 4, 32, 32>}, {transform_indices = @transform_5, window_bounds = array<i64: 4, 32, 32>}]} {
    %c0_i32 = arith.constant 0 : i32
    %0 = arith.cmpi eq, %arg1, %c0_i32 : i32
    %1 = arith.extui %0 : i1 to i32
    %c0_i32_0 = arith.constant 0 : i32
    %2 = arith.cmpi ne, %1, %c0_i32_0 : i32
    scf.if %2 {
      %cst_10 = arith.constant 0.000000e+00 : f32
      %12 = vector.broadcast %cst_10 : f32 to vector<32x384xf32>
      %c0_11 = arith.constant 0 : index
      %c0_12 = arith.constant 0 : index
      %13 = vector.load %arg8[%c0_11, %c0_12] : memref<32x384xf32, #tpu.memory_space<vmem>>, vector<32x384xf32>
      tpu.vector_store %arg8[%c0_11, %c0_12], %12 {strides = array<i32>} : memref<32x384xf32, #tpu.memory_space<vmem>>, vector<32x384xf32>,
    } else {
    }
    %c0 = arith.constant 0 : index
    %c0_1 = arith.constant 0 : index
    %3 = vector.load %arg8[%c0, %c0_1] : memref<32x384xf32, #tpu.memory_space<vmem>>, vector<32x384xf32>
    %c0_2 = arith.constant 0 : index
    %c0_3 = arith.constant 0 : index
    %4 = vector.load %arg2[%c0_2, %c0_3] : memref<32x128xbf16, #tpu.memory_space<vmem>>, vector<32x128xbf16>
    %c0_4 = arith.constant 0 : index
    %c0_5 = arith.constant 0 : index
    %5 = vector.load %arg3[%c0_4, %c0_5] : memref<128x384xbf16, #tpu.memory_space<vmem>>, vector<128x384xbf16>
    %cst = arith.constant dense<0.000000e+00> : vector<32x384xf32>
    %6 = tpu.matmul %4, %5, %cst {dimension_numbers = #tpu.dot_dimension_numbers<[1], [0], [0], [1], [0, 0, 1, 1], [], []>} : vector<32x128xbf16>, vector<128x384xbf16>, vector<32x384xf32> -> vector<32x384xf32>
    %7 = arith.addf %3, %6 : vector<32x384xf32>
    %c0_6 = arith.constant 0 : index
    %c0_7 = arith.constant 0 : index
    %8 = vector.load %arg8[%c0_6, %c0_7] : memref<32x384xf32, #tpu.memory_space<vmem>>, vector<32x384xf32>
    tpu.vector_store %arg8[%c0_6, %c0_7], %7 {strides = array<i32>} : memref<32x384xf32, #tpu.memory_space<vmem>>, vector<32x384xf32>,
    %c0_i32_8 = arith.constant 0 : i32
    %9 = arith.cmpi eq, %arg1, %c0_i32_8 : i32
    %10 = arith.extui %9 : i1 to i32
    %c0_i32_9 = arith.constant 0 : i32
    %11 = arith.cmpi ne, %10, %c0_i32_9 : i32
    scf.if %11 {
      %c0_10 = arith.constant 0 : index
      %c0_11 = arith.constant 0 : index
      %12 = vector.load %arg8[%c0_10, %c0_11] : memref<32x384xf32, #tpu.memory_space<vmem>>, vector<32x384xf32>
      %c0_12 = arith.constant 0 : index
      %c0_13 = arith.constant 0 : index
      %13 = vector.load %arg4[%c0_12, %c0_13] : memref<1x384xf32, #tpu.memory_space<vmem>>, vector<1x384xf32>
      %14 = vector.broadcast %13 : vector<1x384xf32> to vector<32x384xf32>
      %15 = arith.addf %12, %14 : vector<32x384xf32>
      %16 = vector.extract_strided_slice %15 {offsets = [0, 0], sizes = [32, 32], strides = [1, 1]} : vector<32x384xf32> to vector<32x32xf32>
      %17 = arith.truncf %16 : vector<32x32xf32> to vector<32x32xbf16>
      %c0_14 = arith.constant 0 : index
      %c0_15 = arith.constant 0 : index
      %c0_16 = arith.constant 0 : index
      %18 = vector.load %arg5[%c0_14, %c0_15, %c0_16] : memref<4x32x32xbf16, #tpu.memory_space<vmem>>, vector<1x32x32xbf16>
      %19 = vector.shape_cast %18 : vector<1x32x32xbf16> to vector<32x32xbf16>
      %20 = vector.shape_cast %17 : vector<32x32xbf16> to vector<1x32x32xbf16>
      tpu.vector_store %arg5[%c0_14, %c0_15, %c0_16], %20 {strides = array<i32>} : memref<4x32x32xbf16, #tpu.memory_space<vmem>>, vector<1x32x32xbf16>,
      %21 = vector.extract_strided_slice %15 {offsets = [0, 128], sizes = [32, 32], strides = [1, 1]} : vector<32x384xf32> to vector<32x32xf32>
      %22 = arith.truncf %21 : vector<32x32xf32> to vector<32x32xbf16>
      %c0_17 = arith.constant 0 : index
      %c0_18 = arith.constant 0 : index
      %c0_19 = arith.constant 0 : index
      %23 = vector.load %arg6[%c0_17, %c0_18, %c0_19] : memref<4x32x32xbf16, #tpu.memory_space<vmem>>, vector<1x32x32xbf16>
      %24 = vector.shape_cast %23 : vector<1x32x32xbf16> to vector<32x32xbf16>
      %25 = vector.shape_cast %22 : vector<32x32xbf16> to vector<1x32x32xbf16>
      tpu.vector_store %arg6[%c0_17, %c0_18, %c0_19], %25 {strides = array<i32>} : memref<4x32x32xbf16, #tpu.memory_space<vmem>>, vector<1x32x32xbf16>,
      %26 = vector.extract_strided_slice %15 {offsets = [0, 256], sizes = [32, 32], strides = [1, 1]} : vector<32x384xf32> to vector<32x32xf32>
      %27 = arith.truncf %26 : vector<32x32xf32> to vector<32x32xbf16>
      %c0_20 = arith.constant 0 : index
      %c0_21 = arith.constant 0 : index
      %c0_22 = arith.constant 0 : index
      %28 = vector.load %arg7[%c0_20, %c0_21, %c0_22] : memref<4x32x32xbf16, #tpu.memory_space<vmem>>, vector<1x32x32xbf16>
      %29 = vector.shape_cast %28 : vector<1x32x32xbf16> to vector<32x32xbf16>
      %30 = vector.shape_cast %27 : vector<32x32xbf16> to vector<1x32x32xbf16>
      tpu.vector_store %arg7[%c0_20, %c0_21, %c0_22], %30 {strides = array<i32>} : memref<4x32x32xbf16, #tpu.memory_space<vmem>>, vector<1x32x32xbf16>,
      %31 = vector.extract_strided_slice %15 {offsets = [0, 32], sizes = [32, 32], strides = [1, 1]} : vector<32x384xf32> to vector<32x32xf32>
      %32 = arith.truncf %31 : vector<32x32xf32> to vector<32x32xbf16>
      %c1 = arith.constant 1 : index
      %c0_23 = arith.constant 0 : index
      %c0_24 = arith.constant 0 : index
      %33 = vector.load %arg5[%c1, %c0_23, %c0_24] : memref<4x32x32xbf16, #tpu.memory_space<vmem>>, vector<1x32x32xbf16>
      %34 = vector.shape_cast %33 : vector<1x32x32xbf16> to vector<32x32xbf16>
      %35 = vector.shape_cast %32 : vector<32x32xbf16> to vector<1x32x32xbf16>
      tpu.vector_store %arg5[%c1, %c0_23, %c0_24], %35 {strides = array<i32>} : memref<4x32x32xbf16, #tpu.memory_space<vmem>>, vector<1x32x32xbf16>,
      %36 = vector.extract_strided_slice %15 {offsets = [0, 160], sizes = [32, 32], strides = [1, 1]} : vector<32x384xf32> to vector<32x32xf32>
      %37 = arith.truncf %36 : vector<32x32xf32> to vector<32x32xbf16>
      %c1_25 = arith.constant 1 : index
      %c0_26 = arith.constant 0 : index
      %c0_27 = arith.constant 0 : index
      %38 = vector.load %arg6[%c1_25, %c0_26, %c0_27] : memref<4x32x32xbf16, #tpu.memory_space<vmem>>, vector<1x32x32xbf16>
      %39 = vector.shape_cast %38 : vector<1x32x32xbf16> to vector<32x32xbf16>
      %40 = vector.shape_cast %37 : vector<32x32xbf16> to vector<1x32x32xbf16>
      tpu.vector_store %arg6[%c1_25, %c0_26, %c0_27], %40 {strides = array<i32>} : memref<4x32x32xbf16, #tpu.memory_space<vmem>>, vector<1x32x32xbf16>,
      %41 = vector.extract_strided_slice %15 {offsets = [0, 288], sizes = [32, 32], strides = [1, 1]} : vector<32x384xf32> to vector<32x32xf32>
      %42 = arith.truncf %41 : vector<32x32xf32> to vector<32x32xbf16>
      %c1_28 = arith.constant 1 : index
      %c0_29 = arith.constant 0 : index
      %c0_30 = arith.constant 0 : index
      %43 = vector.load %arg7[%c1_28, %c0_29, %c0_30] : memref<4x32x32xbf16, #tpu.memory_space<vmem>>, vector<1x32x32xbf16>
      %44 = vector.shape_cast %43 : vector<1x32x32xbf16> to vector<32x32xbf16>
      %45 = vector.shape_cast %42 : vector<32x32xbf16> to vector<1x32x32xbf16>
      tpu.vector_store %arg7[%c1_28, %c0_29, %c0_30], %45 {strides = array<i32>} : memref<4x32x32xbf16, #tpu.memory_space<vmem>>, vector<1x32x32xbf16>,
      %46 = vector.extract_strided_slice %15 {offsets = [0, 64], sizes = [32, 32], strides = [1, 1]} : vector<32x384xf32> to vector<32x32xf32>
      %47 = arith.truncf %46 : vector<32x32xf32> to vector<32x32xbf16>
      %c2 = arith.constant 2 : index
      %c0_31 = arith.constant 0 : index
      %c0_32 = arith.constant 0 : index
      %48 = vector.load %arg5[%c2, %c0_31, %c0_32] : memref<4x32x32xbf16, #tpu.memory_space<vmem>>, vector<1x32x32xbf16>
      %49 = vector.shape_cast %48 : vector<1x32x32xbf16> to vector<32x32xbf16>
      %50 = vector.shape_cast %47 : vector<32x32xbf16> to vector<1x32x32xbf16>
      tpu.vector_store %arg5[%c2, %c0_31, %c0_32], %50 {strides = array<i32>} : memref<4x32x32xbf16, #tpu.memory_space<vmem>>, vector<1x32x32xbf16>,
      %51 = vector.extract_strided_slice %15 {offsets = [0, 192], sizes = [32, 32], strides = [1, 1]} : vector<32x384xf32> to vector<32x32xf32>
      %52 = arith.truncf %51 : vector<32x32xf32> to vector<32x32xbf16>
      %c2_33 = arith.constant 2 : index
      %c0_34 = arith.constant 0 : index
      %c0_35 = arith.constant 0 : index
      %53 = vector.load %arg6[%c2_33, %c0_34, %c0_35] : memref<4x32x32xbf16, #tpu.memory_space<vmem>>, vector<1x32x32xbf16>
      %54 = vector.shape_cast %53 : vector<1x32x32xbf16> to vector<32x32xbf16>
      %55 = vector.shape_cast %52 : vector<32x32xbf16> to vector<1x32x32xbf16>
      tpu.vector_store %arg6[%c2_33, %c0_34, %c0_35], %55 {strides = array<i32>} : memref<4x32x32xbf16, #tpu.memory_space<vmem>>, vector<1x32x32xbf16>,
      %56 = vector.extract_strided_slice %15 {offsets = [0, 320], sizes = [32, 32], strides = [1, 1]} : vector<32x384xf32> to vector<32x32xf32>
      %57 = arith.truncf %56 : vector<32x32xf32> to vector<32x32xbf16>
      %c2_36 = arith.constant 2 : index
      %c0_37 = arith.constant 0 : index
      %c0_38 = arith.constant 0 : index
      %58 = vector.load %arg7[%c2_36, %c0_37, %c0_38] : memref<4x32x32xbf16, #tpu.memory_space<vmem>>, vector<1x32x32xbf16>
      %59 = vector.shape_cast %58 : vector<1x32x32xbf16> to vector<32x32xbf16>
      %60 = vector.shape_cast %57 : vector<32x32xbf16> to vector<1x32x32xbf16>
      tpu.vector_store %arg7[%c2_36, %c0_37, %c0_38], %60 {strides = array<i32>} : memref<4x32x32xbf16, #tpu.memory_space<vmem>>, vector<1x32x32xbf16>,
      %61 = vector.extract_strided_slice %15 {offsets = [0, 96], sizes = [32, 32], strides = [1, 1]} : vector<32x384xf32> to vector<32x32xf32>
      %62 = arith.truncf %61 : vector<32x32xf32> to vector<32x32xbf16>
      %c3 = arith.constant 3 : index
      %c0_39 = arith.constant 0 : index
      %c0_40 = arith.constant 0 : index
      %63 = vector.load %arg5[%c3, %c0_39, %c0_40] : memref<4x32x32xbf16, #tpu.memory_space<vmem>>, vector<1x32x32xbf16>
      %64 = vector.shape_cast %63 : vector<1x32x32xbf16> to vector<32x32xbf16>
      %65 = vector.shape_cast %62 : vector<32x32xbf16> to vector<1x32x32xbf16>
      tpu.vector_store %arg5[%c3, %c0_39, %c0_40], %65 {strides = array<i32>} : memref<4x32x32xbf16, #tpu.memory_space<vmem>>, vector<1x32x32xbf16>,
      %66 = vector.extract_strided_slice %15 {offsets = [0, 224], sizes = [32, 32], strides = [1, 1]} : vector<32x384xf32> to vector<32x32xf32>
      %67 = arith.truncf %66 : vector<32x32xf32> to vector<32x32xbf16>
      %c3_41 = arith.constant 3 : index
      %c0_42 = arith.constant 0 : index
      %c0_43 = arith.constant 0 : index
      %68 = vector.load %arg6[%c3_41, %c0_42, %c0_43] : memref<4x32x32xbf16, #tpu.memory_space<vmem>>, vector<1x32x32xbf16>
      %69 = vector.shape_cast %68 : vector<1x32x32xbf16> to vector<32x32xbf16>
      %70 = vector.shape_cast %67 : vector<32x32xbf16> to vector<1x32x32xbf16>
      tpu.vector_store %arg6[%c3_41, %c0_42, %c0_43], %70 {strides = array<i32>} : memref<4x32x32xbf16, #tpu.memory_space<vmem>>, vector<1x32x32xbf16>,
      %71 = vector.extract_strided_slice %15 {offsets = [0, 352], sizes = [32, 32], strides = [1, 1]} : vector<32x384xf32> to vector<32x32xf32>
      %72 = arith.truncf %71 : vector<32x32xf32> to vector<32x32xbf16>
      %c3_44 = arith.constant 3 : index
      %c0_45 = arith.constant 0 : index
      %c0_46 = arith.constant 0 : index
      %73 = vector.load %arg7[%c3_44, %c0_45, %c0_46] : memref<4x32x32xbf16, #tpu.memory_space<vmem>>, vector<1x32x32xbf16>
      %74 = vector.shape_cast %73 : vector<1x32x32xbf16> to vector<32x32xbf16>
      %75 = vector.shape_cast %72 : vector<32x32xbf16> to vector<1x32x32xbf16>
      tpu.vector_store %arg7[%c3_44, %c0_45, %c0_46], %75 {strides = array<i32>} : memref<4x32x32xbf16, #tpu.memory_space<vmem>>, vector<1x32x32xbf16>,
    } else {
    }
    return
  }
  func.func @transform_0(%arg0: i32, %arg1: i32) -> (i32, i32) {
    %c0_i32 = arith.constant 0 : i32
    return %arg0, %arg1 : i32, i32
  }
  func.func @transform_1(%arg0: i32, %arg1: i32) -> (i32, i32) {
    %c0_i32 = arith.constant 0 : i32
    %c0_i32_0 = arith.constant 0 : i32
    return %arg1, %c0_i32 : i32, i32
  }
  func.func @transform_2(%arg0: i32, %arg1: i32) -> (i32, i32) {
    %c0_i32 = arith.constant 0 : i32
    %c0_i32_0 = arith.constant 0 : i32
    %c0_i32_1 = arith.constant 0 : i32
    return %c0_i32, %c0_i32_0 : i32, i32
  }
  func.func @transform_3(%arg0: i32, %arg1: i32) -> (i32, i32, i32) {
    %c0_i32 = arith.constant 0 : i32
    %c0_i32_0 = arith.constant 0 : i32
    %c0_i32_1 = arith.constant 0 : i32
    return %c0_i32, %arg0, %c0_i32_0 : i32, i32, i32
  }
  func.func @transform_4(%arg0: i32, %arg1: i32) -> (i32, i32, i32) {
    %c0_i32 = arith.constant 0 : i32
    %c0_i32_0 = arith.constant 0 : i32
    %c0_i32_1 = arith.constant 0 : i32
    return %c0_i32, %arg0, %c0_i32_0 : i32, i32, i32
  }
  func.func @transform_5(%arg0: i32, %arg1: i32) -> (i32, i32, i32) {
    %c0_i32 = arith.constant 0 : i32
    %c0_i32_0 = arith.constant 0 : i32
    %c0_i32_1 = arith.constant 0 : i32
    return %c0_i32, %arg0, %c0_i32_0 : i32, i32, i32
  }
}

module attributes {stable_mosaic.version = 11 : i64} {
  func.func @_ffn_addln_kernel(%arg0: i32, %arg1: i32, %arg2: memref<32x128xbf16, #tpu.memory_space<vmem>>, %arg3: memref<128x256xbf16, #tpu.memory_space<vmem>>, %arg4: memref<1x256xf32, #tpu.memory_space<vmem>>, %arg5: memref<256x128xbf16, #tpu.memory_space<vmem>>, %arg6: memref<1x128xf32, #tpu.memory_space<vmem>>, %arg7: memref<1x128xf32, #tpu.memory_space<vmem>>, %arg8: memref<1x128xf32, #tpu.memory_space<vmem>>, %arg9: memref<32x128xbf16, #tpu.memory_space<vmem>>, %arg10: memref<32x128xf32, #tpu.memory_space<vmem>>) attributes {dimension_semantics = [#tpu.dimension_semantics<parallel>, #tpu.dimension_semantics<arbitrary>], iteration_bounds = array<i64: 1, 1>, scalar_prefetch = 0 : i64, scratch_operands = 1 : i64, tpu.core_type = #tpu.core_type<tc>, window_params = [{transform_indices = @transform_0, window_bounds = array<i64: 32, 128>}, {transform_indices = @transform_1, window_bounds = array<i64: 128, 256>}, {transform_indices = @transform_2, window_bounds = array<i64: 1, 256>}, {transform_indices = @transform_3, window_bounds = array<i64: 256, 128>}, {pipeline_mode = #tpu.pipeline_mode<synchronous>, transform_indices = @transform_4, window_bounds = array<i64: 1, 128>}, {pipeline_mode = #tpu.pipeline_mode<synchronous>, transform_indices = @transform_5, window_bounds = array<i64: 1, 128>}, {pipeline_mode = #tpu.pipeline_mode<synchronous>, transform_indices = @transform_6, window_bounds = array<i64: 1, 128>}, {transform_indices = @transform_7, window_bounds = array<i64: 32, 128>}]} {
    %c0_i32 = arith.constant 0 : i32
    %0 = arith.cmpi eq, %arg1, %c0_i32 : i32
    %1 = arith.extui %0 : i1 to i32
    %c0_i32_0 = arith.constant 0 : i32
    %2 = arith.cmpi ne, %1, %c0_i32_0 : i32
    scf.if %2 {
      %cst_16 = arith.constant 0.000000e+00 : f32
      %20 = vector.broadcast %cst_16 : f32 to vector<32x128xf32>
      %c0_17 = arith.constant 0 : index
      %c0_18 = arith.constant 0 : index
      %21 = vector.load %arg10[%c0_17, %c0_18] : memref<32x128xf32, #tpu.memory_space<vmem>>, vector<32x128xf32>
      tpu.vector_store %arg10[%c0_17, %c0_18], %20 {strides = array<i32>} : memref<32x128xf32, #tpu.memory_space<vmem>>, vector<32x128xf32>,
    } else {
    }
    %c0 = arith.constant 0 : index
    %c0_1 = arith.constant 0 : index
    %3 = vector.load %arg2[%c0, %c0_1] : memref<32x128xbf16, #tpu.memory_space<vmem>>, vector<32x128xbf16>
    %c0_2 = arith.constant 0 : index
    %c0_3 = arith.constant 0 : index
    %4 = vector.load %arg3[%c0_2, %c0_3] : memref<128x256xbf16, #tpu.memory_space<vmem>>, vector<128x256xbf16>
    %cst = arith.constant dense<0.000000e+00> : vector<32x256xf32>
    %5 = tpu.matmul %3, %4, %cst {dimension_numbers = #tpu.dot_dimension_numbers<[1], [0], [0], [1], [0, 0, 1, 1], [], []>} : vector<32x128xbf16>, vector<128x256xbf16>, vector<32x256xf32> -> vector<32x256xf32>
    %c0_4 = arith.constant 0 : index
    %c0_5 = arith.constant 0 : index
    %6 = vector.load %arg4[%c0_4, %c0_5] : memref<1x256xf32, #tpu.memory_space<vmem>>, vector<1x256xf32>
    %7 = vector.broadcast %6 : vector<1x256xf32> to vector<32x256xf32>
    %8 = arith.addf %5, %7 : vector<32x256xf32>
    %cst_6 = arith.constant 0.000000e+00 : f32
    %9 = vector.broadcast %cst_6 : f32 to vector<32x256xf32>
    %10 = arith.maximumf %8, %9 : vector<32x256xf32>
    %c0_7 = arith.constant 0 : index
    %c0_8 = arith.constant 0 : index
    %11 = vector.load %arg10[%c0_7, %c0_8] : memref<32x128xf32, #tpu.memory_space<vmem>>, vector<32x128xf32>
    %12 = arith.truncf %10 : vector<32x256xf32> to vector<32x256xbf16>
    %c0_9 = arith.constant 0 : index
    %c0_10 = arith.constant 0 : index
    %13 = vector.load %arg5[%c0_9, %c0_10] : memref<256x128xbf16, #tpu.memory_space<vmem>>, vector<256x128xbf16>
    %cst_11 = arith.constant dense<0.000000e+00> : vector<32x128xf32>
    %14 = tpu.matmul %12, %13, %cst_11 {dimension_numbers = #tpu.dot_dimension_numbers<[1], [0], [0], [1], [0, 0, 1, 1], [], []>} : vector<32x256xbf16>, vector<256x128xbf16>, vector<32x128xf32> -> vector<32x128xf32>
    %15 = arith.addf %11, %14 : vector<32x128xf32>
    %c0_12 = arith.constant 0 : index
    %c0_13 = arith.constant 0 : index
    %16 = vector.load %arg10[%c0_12, %c0_13] : memref<32x128xf32, #tpu.memory_space<vmem>>, vector<32x128xf32>
    tpu.vector_store %arg10[%c0_12, %c0_13], %15 {strides = array<i32>} : memref<32x128xf32, #tpu.memory_space<vmem>>, vector<32x128xf32>,
    %c0_i32_14 = arith.constant 0 : i32
    %17 = arith.cmpi eq, %arg1, %c0_i32_14 : i32
    %18 = arith.extui %17 : i1 to i32
    %c0_i32_15 = arith.constant 0 : i32
    %19 = arith.cmpi ne, %18, %c0_i32_15 : i32
    scf.if %19 {
      %c0_16 = arith.constant 0 : index
      %c0_17 = arith.constant 0 : index
      %20 = vector.load %arg10[%c0_16, %c0_17] : memref<32x128xf32, #tpu.memory_space<vmem>>, vector<32x128xf32>
      %c0_18 = arith.constant 0 : index
      %c0_19 = arith.constant 0 : index
      %21 = vector.load %arg6[%c0_18, %c0_19] : memref<1x128xf32, #tpu.memory_space<vmem>>, vector<1x128xf32>
      %22 = vector.broadcast %21 : vector<1x128xf32> to vector<32x128xf32>
      %23 = arith.addf %20, %22 : vector<32x128xf32>
      %c0_20 = arith.constant 0 : index
      %c0_21 = arith.constant 0 : index
      %24 = vector.load %arg2[%c0_20, %c0_21] : memref<32x128xbf16, #tpu.memory_space<vmem>>, vector<32x128xbf16>
      %25 = arith.extf %24 : vector<32x128xbf16> to vector<32x128xf32>
      %26 = arith.addf %23, %25 : vector<32x128xf32>
      %cst_22 = arith.constant dense<0.000000e+00> : vector<32xf32>
      %27 = vector.multi_reduction <add>, %26, %cst_22 [1] : vector<32x128xf32> to vector<32xf32>
      %28 = vector.shape_cast %27 : vector<32xf32> to vector<32x1xf32>
      %cst_23 = arith.constant 1.280000e+02 : f32
      %29 = vector.broadcast %cst_23 : f32 to vector<32x1xf32>
      %30 = arith.divf %28, %29 : vector<32x1xf32>
      %31 = vector.broadcast %30 : vector<32x1xf32> to vector<32x128xf32>
      %32 = arith.subf %26, %31 : vector<32x128xf32>
      %33 = arith.mulf %32, %32 : vector<32x128xf32>
      %cst_24 = arith.constant dense<0.000000e+00> : vector<32xf32>
      %34 = vector.multi_reduction <add>, %33, %cst_24 [1] : vector<32x128xf32> to vector<32xf32>
      %35 = vector.shape_cast %34 : vector<32xf32> to vector<32x1xf32>
      %cst_25 = arith.constant 1.280000e+02 : f32
      %36 = vector.broadcast %cst_25 : f32 to vector<32x1xf32>
      %37 = arith.divf %35, %36 : vector<32x1xf32>
      %cst_26 = arith.constant 9.99999974E-6 : f32
      %38 = vector.broadcast %cst_26 : f32 to vector<32x1xf32>
      %39 = arith.addf %37, %38 : vector<32x1xf32>
      %40 = math.rsqrt %39 : vector<32x1xf32>
      %41 = vector.broadcast %40 : vector<32x1xf32> to vector<32x128xf32>
      %42 = arith.mulf %32, %41 : vector<32x128xf32>
      %c0_27 = arith.constant 0 : index
      %c0_28 = arith.constant 0 : index
      %43 = vector.load %arg7[%c0_27, %c0_28] : memref<1x128xf32, #tpu.memory_space<vmem>>, vector<1x128xf32>
      %44 = vector.broadcast %43 : vector<1x128xf32> to vector<32x128xf32>
      %45 = arith.mulf %42, %44 : vector<32x128xf32>
      %c0_29 = arith.constant 0 : index
      %c0_30 = arith.constant 0 : index
      %46 = vector.load %arg8[%c0_29, %c0_30] : memref<1x128xf32, #tpu.memory_space<vmem>>, vector<1x128xf32>
      %47 = vector.broadcast %46 : vector<1x128xf32> to vector<32x128xf32>
      %48 = arith.addf %45, %47 : vector<32x128xf32>
      %49 = arith.truncf %48 : vector<32x128xf32> to vector<32x128xbf16>
      %c0_31 = arith.constant 0 : index
      %c0_32 = arith.constant 0 : index
      %50 = vector.load %arg9[%c0_31, %c0_32] : memref<32x128xbf16, #tpu.memory_space<vmem>>, vector<32x128xbf16>
      tpu.vector_store %arg9[%c0_31, %c0_32], %49 {strides = array<i32>} : memref<32x128xbf16, #tpu.memory_space<vmem>>, vector<32x128xbf16>,
    } else {
    }
    return
  }
  func.func @transform_0(%arg0: i32, %arg1: i32) -> (i32, i32) {
    %c0_i32 = arith.constant 0 : i32
    %c0_i32_0 = arith.constant 0 : i32
    return %arg0, %c0_i32 : i32, i32
  }
  func.func @transform_1(%arg0: i32, %arg1: i32) -> (i32, i32) {
    %c0_i32 = arith.constant 0 : i32
    %c0_i32_0 = arith.constant 0 : i32
    return %c0_i32, %arg1 : i32, i32
  }
  func.func @transform_2(%arg0: i32, %arg1: i32) -> (i32, i32) {
    %c0_i32 = arith.constant 0 : i32
    %c0_i32_0 = arith.constant 0 : i32
    return %c0_i32, %arg1 : i32, i32
  }
  func.func @transform_3(%arg0: i32, %arg1: i32) -> (i32, i32) {
    %c0_i32 = arith.constant 0 : i32
    %c0_i32_0 = arith.constant 0 : i32
    return %arg1, %c0_i32 : i32, i32
  }
  func.func @transform_4(%arg0: i32, %arg1: i32) -> (i32, i32) {
    %c0_i32 = arith.constant 0 : i32
    %c0_i32_0 = arith.constant 0 : i32
    %c0_i32_1 = arith.constant 0 : i32
    return %c0_i32, %c0_i32_0 : i32, i32
  }
  func.func @transform_5(%arg0: i32, %arg1: i32) -> (i32, i32) {
    %c0_i32 = arith.constant 0 : i32
    %c0_i32_0 = arith.constant 0 : i32
    %c0_i32_1 = arith.constant 0 : i32
    return %c0_i32, %c0_i32_0 : i32, i32
  }
  func.func @transform_6(%arg0: i32, %arg1: i32) -> (i32, i32) {
    %c0_i32 = arith.constant 0 : i32
    %c0_i32_0 = arith.constant 0 : i32
    %c0_i32_1 = arith.constant 0 : i32
    return %c0_i32, %c0_i32_0 : i32, i32
  }
  func.func @transform_7(%arg0: i32, %arg1: i32) -> (i32, i32) {
    %c0_i32 = arith.constant 0 : i32
    %c0_i32_0 = arith.constant 0 : i32
    return %arg0, %c0_i32 : i32, i32
  }
}

module attributes {stable_mosaic.version = 11 : i64} {
  func.func @_ffn_addln_kernel(%arg0: i32, %arg1: i32, %arg2: memref<32x128xbf16, #tpu.memory_space<vmem>>, %arg3: memref<128x256xbf16, #tpu.memory_space<vmem>>, %arg4: memref<1x256xf32, #tpu.memory_space<vmem>>, %arg5: memref<256x128xbf16, #tpu.memory_space<vmem>>, %arg6: memref<1x128xf32, #tpu.memory_space<vmem>>, %arg7: memref<1x128xf32, #tpu.memory_space<vmem>>, %arg8: memref<1x128xf32, #tpu.memory_space<vmem>>, %arg9: memref<32x128xbf16, #tpu.memory_space<vmem>>, %arg10: memref<32x128xf32, #tpu.memory_space<vmem>>) attributes {dimension_semantics = [#tpu.dimension_semantics<parallel>, #tpu.dimension_semantics<arbitrary>], iteration_bounds = array<i64: 1, 1>, scalar_prefetch = 0 : i64, scratch_operands = 1 : i64, tpu.core_type = #tpu.core_type<tc>, window_params = [{transform_indices = @transform_0, window_bounds = array<i64: 32, 128>}, {transform_indices = @transform_1, window_bounds = array<i64: 128, 256>}, {transform_indices = @transform_2, window_bounds = array<i64: 1, 256>}, {transform_indices = @transform_3, window_bounds = array<i64: 256, 128>}, {pipeline_mode = #tpu.pipeline_mode<synchronous>, transform_indices = @transform_4, window_bounds = array<i64: 1, 128>}, {pipeline_mode = #tpu.pipeline_mode<synchronous>, transform_indices = @transform_5, window_bounds = array<i64: 1, 128>}, {pipeline_mode = #tpu.pipeline_mode<synchronous>, transform_indices = @transform_6, window_bounds = array<i64: 1, 128>}, {transform_indices = @transform_7, window_bounds = array<i64: 32, 128>}]} {
    %c0_i32 = arith.constant 0 : i32
    %0 = arith.cmpi eq, %arg1, %c0_i32 : i32
    %1 = arith.extui %0 : i1 to i32
    %c0_i32_0 = arith.constant 0 : i32
    %2 = arith.cmpi ne, %1, %c0_i32_0 : i32
    scf.if %2 {
      %cst_16 = arith.constant 0.000000e+00 : f32
      %20 = vector.broadcast %cst_16 : f32 to vector<32x128xf32>
      %c0_17 = arith.constant 0 : index
      %c0_18 = arith.constant 0 : index
      %21 = vector.load %arg10[%c0_17, %c0_18] : memref<32x128xf32, #tpu.memory_space<vmem>>, vector<32x128xf32>
      tpu.vector_store %arg10[%c0_17, %c0_18], %20 {strides = array<i32>} : memref<32x128xf32, #tpu.memory_space<vmem>>, vector<32x128xf32>,
    } else {
    }
    %c0 = arith.constant 0 : index
    %c0_1 = arith.constant 0 : index
    %3 = vector.load %arg2[%c0, %c0_1] : memref<32x128xbf16, #tpu.memory_space<vmem>>, vector<32x128xbf16>
    %c0_2 = arith.constant 0 : index
    %c0_3 = arith.constant 0 : index
    %4 = vector.load %arg3[%c0_2, %c0_3] : memref<128x256xbf16, #tpu.memory_space<vmem>>, vector<128x256xbf16>
    %cst = arith.constant dense<0.000000e+00> : vector<32x256xf32>
    %5 = tpu.matmul %3, %4, %cst {dimension_numbers = #tpu.dot_dimension_numbers<[1], [0], [0], [1], [0, 0, 1, 1], [], []>} : vector<32x128xbf16>, vector<128x256xbf16>, vector<32x256xf32> -> vector<32x256xf32>
    %c0_4 = arith.constant 0 : index
    %c0_5 = arith.constant 0 : index
    %6 = vector.load %arg4[%c0_4, %c0_5] : memref<1x256xf32, #tpu.memory_space<vmem>>, vector<1x256xf32>
    %7 = vector.broadcast %6 : vector<1x256xf32> to vector<32x256xf32>
    %8 = arith.addf %5, %7 : vector<32x256xf32>
    %cst_6 = arith.constant 0.000000e+00 : f32
    %9 = vector.broadcast %cst_6 : f32 to vector<32x256xf32>
    %10 = arith.maximumf %8, %9 : vector<32x256xf32>
    %c0_7 = arith.constant 0 : index
    %c0_8 = arith.constant 0 : index
    %11 = vector.load %arg10[%c0_7, %c0_8] : memref<32x128xf32, #tpu.memory_space<vmem>>, vector<32x128xf32>
    %12 = arith.truncf %10 : vector<32x256xf32> to vector<32x256xbf16>
    %c0_9 = arith.constant 0 : index
    %c0_10 = arith.constant 0 : index
    %13 = vector.load %arg5[%c0_9, %c0_10] : memref<256x128xbf16, #tpu.memory_space<vmem>>, vector<256x128xbf16>
    %cst_11 = arith.constant dense<0.000000e+00> : vector<32x128xf32>
    %14 = tpu.matmul %12, %13, %cst_11 {dimension_numbers = #tpu.dot_dimension_numbers<[1], [0], [0], [1], [0, 0, 1, 1], [], []>} : vector<32x256xbf16>, vector<256x128xbf16>, vector<32x128xf32> -> vector<32x128xf32>
    %15 = arith.addf %11, %14 : vector<32x128xf32>
    %c0_12 = arith.constant 0 : index
    %c0_13 = arith.constant 0 : index
    %16 = vector.load %arg10[%c0_12, %c0_13] : memref<32x128xf32, #tpu.memory_space<vmem>>, vector<32x128xf32>
    tpu.vector_store %arg10[%c0_12, %c0_13], %15 {strides = array<i32>} : memref<32x128xf32, #tpu.memory_space<vmem>>, vector<32x128xf32>,
    %c0_i32_14 = arith.constant 0 : i32
    %17 = arith.cmpi eq, %arg1, %c0_i32_14 : i32
    %18 = arith.extui %17 : i1 to i32
    %c0_i32_15 = arith.constant 0 : i32
    %19 = arith.cmpi ne, %18, %c0_i32_15 : i32
    scf.if %19 {
      %c0_16 = arith.constant 0 : index
      %c0_17 = arith.constant 0 : index
      %20 = vector.load %arg10[%c0_16, %c0_17] : memref<32x128xf32, #tpu.memory_space<vmem>>, vector<32x128xf32>
      %c0_18 = arith.constant 0 : index
      %c0_19 = arith.constant 0 : index
      %21 = vector.load %arg6[%c0_18, %c0_19] : memref<1x128xf32, #tpu.memory_space<vmem>>, vector<1x128xf32>
      %22 = vector.broadcast %21 : vector<1x128xf32> to vector<32x128xf32>
      %23 = arith.addf %20, %22 : vector<32x128xf32>
      %c0_20 = arith.constant 0 : index
      %c0_21 = arith.constant 0 : index
      %24 = vector.load %arg2[%c0_20, %c0_21] : memref<32x128xbf16, #tpu.memory_space<vmem>>, vector<32x128xbf16>
      %25 = arith.extf %24 : vector<32x128xbf16> to vector<32x128xf32>
      %26 = arith.addf %23, %25 : vector<32x128xf32>
      %cst_22 = arith.constant dense<0.000000e+00> : vector<32xf32>
      %27 = vector.multi_reduction <add>, %26, %cst_22 [1] : vector<32x128xf32> to vector<32xf32>
      %28 = vector.shape_cast %27 : vector<32xf32> to vector<32x1xf32>
      %cst_23 = arith.constant 1.280000e+02 : f32
      %29 = vector.broadcast %cst_23 : f32 to vector<32x1xf32>
      %30 = arith.divf %28, %29 : vector<32x1xf32>
      %31 = vector.broadcast %30 : vector<32x1xf32> to vector<32x128xf32>
      %32 = arith.subf %26, %31 : vector<32x128xf32>
      %33 = arith.mulf %32, %32 : vector<32x128xf32>
      %cst_24 = arith.constant dense<0.000000e+00> : vector<32xf32>
      %34 = vector.multi_reduction <add>, %33, %cst_24 [1] : vector<32x128xf32> to vector<32xf32>
      %35 = vector.shape_cast %34 : vector<32xf32> to vector<32x1xf32>
      %cst_25 = arith.constant 1.280000e+02 : f32
      %36 = vector.broadcast %cst_25 : f32 to vector<32x1xf32>
      %37 = arith.divf %35, %36 : vector<32x1xf32>
      %cst_26 = arith.constant 9.99999974E-6 : f32
      %38 = vector.broadcast %cst_26 : f32 to vector<32x1xf32>
      %39 = arith.addf %37, %38 : vector<32x1xf32>
      %40 = math.rsqrt %39 : vector<32x1xf32>
      %41 = vector.broadcast %40 : vector<32x1xf32> to vector<32x128xf32>
      %42 = arith.mulf %32, %41 : vector<32x128xf32>
      %c0_27 = arith.constant 0 : index
      %c0_28 = arith.constant 0 : index
      %43 = vector.load %arg7[%c0_27, %c0_28] : memref<1x128xf32, #tpu.memory_space<vmem>>, vector<1x128xf32>
      %44 = vector.broadcast %43 : vector<1x128xf32> to vector<32x128xf32>
      %45 = arith.mulf %42, %44 : vector<32x128xf32>
      %c0_29 = arith.constant 0 : index
      %c0_30 = arith.constant 0 : index
      %46 = vector.load %arg8[%c0_29, %c0_30] : memref<1x128xf32, #tpu.memory_space<vmem>>, vector<1x128xf32>
      %47 = vector.broadcast %46 : vector<1x128xf32> to vector<32x128xf32>
      %48 = arith.addf %45, %47 : vector<32x128xf32>
      %49 = arith.truncf %48 : vector<32x128xf32> to vector<32x128xbf16>
      %c0_31 = arith.constant 0 : index
      %c0_32 = arith.constant 0 : index
      %50 = vector.load %arg9[%c0_31, %c0_32] : memref<32x128xbf16, #tpu.memory_space<vmem>>, vector<32x128xbf16>
      tpu.vector_store %arg9[%c0_31, %c0_32], %49 {strides = array<i32>} : memref<32x128xbf16, #tpu.memory_space<vmem>>, vector<32x128xbf16>,
    } else {
    }
    return
  }
  func.func @transform_0(%arg0: i32, %arg1: i32) -> (i32, i32) {
    %c0_i32 = arith.constant 0 : i32
    %c0_i32_0 = arith.constant 0 : i32
    return %arg0, %c0_i32 : i32, i32
  }
  func.func @transform_1(%arg0: i32, %arg1: i32) -> (i32, i32) {
    %c0_i32 = arith.constant 0 : i32
    %c0_i32_0 = arith.constant 0 : i32
    return %c0_i32, %arg1 : i32, i32
  }
  func.func @transform_2(%arg0: i32, %arg1: i32) -> (i32, i32) {
    %c0_i32 = arith.constant 0 : i32
    %c0_i32_0 = arith.constant 0 : i32
    return %c0_i32, %arg1 : i32, i32
  }
  func.func @transform_3(%arg0: i32, %arg1: i32) -> (i32, i32) {
    %c0_i32 = arith.constant 0 : i32
    %c0_i32_0 = arith.constant 0 : i32
    return %arg1, %c0_i32 : i32, i32
  }
  func.func @transform_4(%arg0: i32, %arg1: i32) -> (i32, i32) {
    %c0_i32 = arith.constant 0 : i32
    %c0_i32_0 = arith.constant 0 : i32
    %c0_i32_1 = arith.constant 0 : i32
    return %c0_i32, %c0_i32_0 : i32, i32
  }
  func.func @transform_5(%arg0: i32, %arg1: i32) -> (i32, i32) {
    %c0_i32 = arith.constant 0 : i32
    %c0_i32_0 = arith.constant 0 : i32
    %c0_i32_1 = arith.constant 0 : i32
    return %c0_i32, %c0_i32_0 : i32, i32
  }
  func.func @transform_6(%arg0: i32, %arg1: i32) -> (i32, i32) {
    %c0_i32 = arith.constant 0 : i32
    %c0_i32_0 = arith.constant 0 : i32
    %c0_i32_1 = arith.constant 0 : i32
    return %c0_i32, %c0_i32_0 : i32, i32
  }
  func.func @transform_7(%arg0: i32, %arg1: i32) -> (i32, i32) {
    %c0_i32 = arith.constant 0 : i32
    %c0_i32_0 = arith.constant 0 : i32
    return %arg0, %c0_i32 : i32, i32
  }
}

</mosaic_0001>

<bundles_post_ra>
// kernel: encoder_forward.9
= control target key start
LH: loop header
LB: loop body
LE: loop exit
PB: predicated region body
PF: predicated region fallthrough
CT: control target
= control target key end

     0   :  { %s421_s9 = smov 0   ;;  %s423_s10 = smov 0   ;;  %s445_s0 = inlined_call_operand.vmem [shape: bf16[2,16,128], index: 0, kind: input, shape index: {}]   ;;  %s446_s1 = inlined_call_operand.vmem [shape: bf16[16,128], index: 1, kind: input, shape index: {}]   ;;  %s447_s2 = inlined_call_operand.vmem [shape: bf16[2,16,128], index: 2, kind: output, shape index: {}]  }
   0x1   :  { %s425_s11 = smov 0  }
   0x2 LB: > { %s24_s12 = sadd.s32 1, %s400_s10  ;;  %p332_p0 = scmp.ge.s32.totalorder %s404_s11, 1  ;;  %s404_s11 = sphi %s425_s11, %s12_s11   ;;  %s400_s10 = sphi %s423_s10, %s449_s10   ;;  %s396_s9 = sphi %s421_s9, %s448_s9  }
   0x3   : > { %p26_p1 = scmp.ge.s32.totalorder %s24_s12, 2  ;;  %p144_p2 = scmp.lt.s32.totalorder %s404_s11, 3 }
   0x5   : > { %s451_s12 = smov (%p26_p1, %s24_s12), 0  ;;  %p145_p3 = pnand %p332_p0, %p144_p2 }
   0x6   : > { %p180_p4 = scmp.lt.s32.totalorder (!%p145_p3), %s396_s9, 1  ;;  %v350_v0 = vld [vmem:[%s446_s1] sm:$0xff] (!%p145_p3)  }
   0x7   : > { %148 = sbr.rel (%p145_p3) target bundleno = 25 (0x19), region = 28  ;;  %v351_v1 = vunpack.c.l.bf16 (!%p145_p3), %v350_v0  ;;  %v352_v2 = vunpack.c.h.bf16 (!%p145_p3), %v350_v0 }
   0xe   : > { %s453_s9 = smov (!%p180_p4, %s396_s9), 1 }
   0xf   : > { %s341_s15 = sshll.u32 %s453_s9, 3 }
  0x10   : > { %s187_s18 = scalar_lea.vmem %s445_s0, %s341_s15  ;;  %s203_s21 = scalar_lea.vmem %s447_s2, %s341_s15 }
  0x11   : > { %v346_v3 = vld [vmem:[%s187_s18] sm:$0xff]  }
  0x12   : > { %v347_v4 = vunpack.c.l.bf16 %v346_v3  ;;  %v348_v5 = vunpack.c.h.bf16 %v346_v3 }
  0x14   : > { %v213_v6 = vadd.f32 %v351_v1, %v347_v4  ;;  %v214_v7 = vadd.f32 %v352_v2, %v348_v5 }
  0x16   : > { %v356_v8 = vpack.c.bf16 %v214_v7, %v213_v6 }
  0x18   : > { %357 = vst [vmem:[%s203_s21] sm:$0xff] %v356_v8  }
  0x19 PF: > { %s12_s11 = sadd.s32 1, %s404_s11   ;;  %s448_s9 = smov %s400_s10 }
  0x1a   : > { %p9_p5 = scmp.ge.s32.totalorder %s12_s11, 4   ;;  %s449_s10 = smov %s451_s12 }
  0x1c   :  { %11 = sbr.rel (!%p9_p5) target bundleno = 2 (0x2), region = 61 }

// kernel: encoder_forward.11
= control target key start
LH: loop header
LB: loop body
LE: loop exit
PB: predicated region body
PF: predicated region fallthrough
CT: control target
= control target key end

     0   :  { %s988_s15 = smov 0   ;;  %s990_s16 = smov 0   ;;  %s1073_s0 = inlined_call_operand.vmem [shape: bf16[4,2,16,32], index: 0, kind: input, shape index: {}]   ;;  %s1074_s1 = inlined_call_operand.vmem [shape: bf16[4,2,16,32], index: 1, kind: input, shape index: {}]   ;;  %s1075_s2 = inlined_call_operand.vmem [shape: bf16[4,2,16,32], index: 2, kind: input, shape index: {}]   ;;  %s1076_s3 = inlined_call_operand.vmem [shape: f32[2,1,16], index: 3, kind: input, shape index: {}]   ;;  %s1077_s4 = inlined_call_operand.vmem [shape: bf16[4,2,16,32], index: 4, kind: output, shape index: {}]  }
   0x1   :  { %s992_s17 = smov 0   ;;  %s994_s18 = smov 0  }
   0x2   :  { %s996_s19 = smov 0  }
   0x3 LB: > { %s36_s20 = sadd.s32 1, %s949_s17  ;;  %s40_s21 = sadd.s32 1, %s953_s18  ;;  %s957_s19 = sphi %s996_s19, %s14_s19   ;;  %s953_s18 = sphi %s994_s18, %s1081_s18   ;;  %s949_s17 = sphi %s992_s17, %s1080_s17   ;;  %s945_s16 = sphi %s990_s16, %s1079_s16   ;;  %s941_s15 = sphi %s988_s15, %s1078_s15  }
   0x4   : > { %p38_p0 = scmp.ge.s32.totalorder %s36_s20, 2  ;;  %p817_p1 = scmp.ge.s32.totalorder %s957_s19, 1 }
   0x5   : > { %p264_p2 = scmp.lt.s32.totalorder %s957_s19, 9 }
   0x6   : > { %s1083_s20 = smov (%p38_p0, %s36_s20), 0  ;;  %s1085_s21 = smov (!%p38_p0, %s40_s21), %s953_s18 }
   0x7   : > { %p265_p3 = pnand %p817_p1, %p264_p2  ;;  %p42_p4 = scmp.ge.s32.totalorder %s1085_s21, 4 }
   0x8   : > { %p339_p5 = scmp.lt.s32.totalorder (!%p265_p3), %s945_s16, 3  ;;  %p341_p6 = scmp.lt.s32.totalorder (!%p265_p3), %s941_s15, 1  ;;  %vm410_vm0 = vcmask (!%p265_p3), 261120   ;;  %v959_v0 = vmov (!%p265_p3), 0.0   ;;  %vm960_vm1 = vmmov (!%p265_p3), 0   ;;  %vm405_vm2 = vcmask (!%p265_p3), 7168  }
   0x9   : > { %s1087_s21 = smov (%p42_p4, %s1085_s21), 0  ;;  %268 = sbr.rel (%p265_p3) target bundleno = 833 (0x341), region = 36 }
   0xa   : > { %846 = vmatprep.subr.bf16.mxu0 (!%p265_p3), %v959_v0  ;;  %411 = vst.msk [vmem:[#allocation4] sm:$0xff] (!%p265_p3), %vm410_vm0, %v959_v0  ;;  %412 = vst.msk [vmem:[#allocation4 + $0x8] sm:$0xff] (!%p265_p3), %vm410_vm0, %v959_v0  ;;  %848 = vmatprep.mubr.msk.bf16.mxu0 (!%p265_p3), %vm960_vm1, %v959_v0  ;;  %v961_v4 = vmov (!%p265_p3), -1e+30   ;;  %vm486_vm3 = vcmask (!%p265_p3), 130048   ;;  %v962_v14 = vmov (!%p265_p3), 0  }
   0xb   : > { %852 = vmatprep.subr.bf16.mxu1 (!%p265_p3), %v959_v0  ;;  %854 = vmatprep.mubr.msk.bf16.mxu1 (!%p265_p3), %vm960_vm1, %v959_v0  ;;  %406 = vst.msk [vmem:[#allocation2] sm:$0xff] (!%p265_p3), %vm405_vm2, %v961_v4  ;;  %407 = vst.msk [vmem:[#allocation2 + $0x8] sm:$0xff] (!%p265_p3), %vm405_vm2, %v961_v4  ;;  %vm632_vm4 = vcmask (!%p265_p3), 257024  }
   0xc   : > { %408 = vst.msk [vmem:[#allocation3] sm:$0xff] (!%p265_p3), %vm405_vm2, %v959_v0  ;;  %409 = vst.msk [vmem:[#allocation3 + $0x8] sm:$0xff] (!%p265_p3), %vm405_vm2, %v959_v0  ;;  %902 = vset.pattern.permute.xlu1 (!%p265_p3), %v962_v14  ;;  %903 = vset.pattern.permute.xlu0 (!%p265_p3), %v962_v14 }
  0x10   : > { %s1089_s16 = smov (!%p339_p5, %s945_s16), 3  ;;  %s1091_s15 = smov (!%p341_p6, %s941_s15), 1 }
  0x11   : > { %s819_s22 = sshll.u32 %s1089_s16, 2  ;;  %s818_s23 = sshll.u32 %s1091_s15, 1  ;;  %v532_v51 = vld [vmem:[#allocation4] sm:$0xff]  ;;  %v533_v53 = vld [vmem:[#allocation4 + $0x8] sm:$0xff] }
  0x12   : > { %s348_s24 = sadd.s32 %s819_s22, %s818_s23  ;;  %s385_s8 = scalar_lea.vmem %s1076_s3, %s1091_s15  ;;  %v484_v15 = vld [vmem:[#allocation2] sm:$0xff]  ;;  %v485_v18 = vld [vmem:[#allocation2 + $0x8] sm:$0xff] }
  0x13   : > { %s1020_s25 = sshll.u32 %s348_s24, 2  ;;  %v830_v5 = vld [vmem:[%s385_s8] ss:$0 sm:$0xff]  ;;  %v517_v39 = vld [vmem:[#allocation3] sm:$0xff]  ;;  %v518_v42 = vld [vmem:[#allocation3 + $0x8] sm:$0xff] }
  0x14   : > { %s364_s28 = scalar_lea.vmem %s1074_s1, %s1020_s25  ;;  %s350_s5 = scalar_lea.vmem %s1073_s0, %s1020_s25 }
  0x15   : > { %v904_v1 = vld [vmem:[%s364_s28] sm:$0xff]   ;;  %s378_s11 = scalar_lea.vmem %s1075_s2, %s1020_s25  ;;  %s398_s14 = scalar_lea.vmem %s1077_s4, %s1020_s25 }
  0x16   : > { %v441_v2 = vsel %vm410_vm0, %v904_v1, 0  ;;  %v905_v3 = vld [vmem:[%s350_s5] sm:$0xff]  }
  0x17   : > { %847 = vmatpush3.bf16.xpose.msra.mxu0 %v441_v2  ;;  %v906_v23 = vld [vmem:[%s378_s11] sm:$0xff]  }
  0x18   : > { %853 = vmatpush3.bf16.msra.mxu1 %v906_v23 }
  0x1e   : > { %849 = vmatmul.mubr.msk.bf16.vlgmr.msra.gmra.mrb[0].mxu0 %vm410_vm0, %v905_v3 }
  0xf1   : > { %v477_v6 = vpop.f32.mrb[0].mxu0 }
  0xf2   : > { %v478_v7 = vadd.f32 %v830_v5, %v477_v6  ;;  %v850_v8 = vpop.f32.mrb[1].mxu0 }
  0xf3   : > { %v480_v9 = vpop.f32.mrb[2].mxu0 }
  0xf4   : > { %v481_v10 = vadd.f32 %v830_v5, %v480_v9  ;;  %v851_v11 = vpop.f32.mrb[3].mxu0  ;;  %v487_v12 = vsel %vm486_vm3, %v478_v7, -inf }
  0xf5   : > { %488 = vmax.xlane.f32.xlu0 %v487_v12 }
  0xf6   : > { %v490_v13 = vsel %vm486_vm3, %v481_v10, -inf }
  0xf9   : > { %491 = vmax.xlane.f32.xlu0 %v490_v13 }
 0x182   : > { %v489_v16 = vpop.xlane.xlu0 %488 }
 0x183   : > { %v493_v17 = vmax.f32 %v484_v15, %v489_v16 }
 0x185   : > { %v495_v19 = vsub.f32 %v484_v15, %v493_v17  ;;  %601 = vst.msk [vmem:[#allocation2] sm:$0xff] %vm405_vm2, %v493_v17  ;;  %503 = vperm.xlu1 %902, %v493_v17  }
 0x186   : > { %v492_v20 = vpop.xlane.xlu0 %491 }
 0x187   : > { %v494_v21 = vmax.f32 %v485_v18, %v492_v20  ;;  %v497_v36 = vmul.f32 1.442695, %v495_v19 }
 0x189   : > { %v496_v22 = vsub.f32 %v485_v18, %v494_v21  ;;  %602 = vst.msk [vmem:[#allocation2 + $0x8] sm:$0xff] %vm405_vm2, %v494_v21  ;;  %508 = vperm.xlu1 %902, %v494_v21  }
 0x18b   : > { %v499_v35 = vmul.f32 1.442695, %v496_v22 }
 0x204   : > { %v504_v24 = vpop.permute.xlu1 %503 }
 0x205   : > { %v511_v25 = vsub.f32 %v478_v7, %v504_v24 }
 0x207   : > { %v513_v26 = vmul.f32 1.442695, %v511_v25 }
 0x208   : > { %v509_v27 = vpop.permute.xlu1 %508 }
 0x209   : > { %907 = vpow2.f32 %v513_v26  ;;  %v512_v28 = vsub.f32 %v481_v10, %v509_v27 }
 0x20b   : > { %v515_v29 = vmul.f32 1.442695, %v512_v28 }
 0x20d   : > { %909 = vpow2.f32 %v515_v29 }
 0x20e   : > { %911 = vpow2.f32 %v499_v35 }
 0x20f   : > { %913 = vpow2.f32 %v497_v36 }
 0x213   : > { %v908_v30 = vpop.eup %907 }
 0x214   : > { %v521_v31 = vsel %vm486_vm3, %v908_v30, 0.0 }
 0x215   : > { %522 = vadd.xlane.f32.xlu0 %v521_v31 }
 0x217   : > { %v910_v32 = vpop.eup %909 }
 0x218   : > { %v524_v33 = vsel %vm486_vm3, %v910_v32, 0.0  ;;  %v546_v34 = vpack.c.bf16 %v910_v32, %v908_v30  ;;  %v912_v37 = vpop.eup %911 }
 0x219   : > { %525 = vadd.xlane.f32.xlu1 %v524_v33  ;;  %v914_v38 = vpop.eup %913  ;;  %v520_v44 = vmul.f32 %v912_v37, %v518_v42 }
 0x21a   : > { %855 = vmatmul.mubr.msk.bf16.vlgmr.msra.gmra.mrb[0].mxu1 %vm486_vm3, %v546_v34  ;;  %v519_v40 = vmul.f32 %v914_v38, %v517_v39 }
 0x22a   : > { %541 = vperm.xlu1 %902, %v912_v37  }
 0x22b   : > { %536 = vperm.xlu0 %903, %v914_v38  }
 0x2a2   : > { %v523_v41 = vpop.xlane.xlu0 %522 }
 0x2a3   : > { %v527_v43 = vadd.f32 %v523_v41, %v519_v40 }
 0x2a5   : > { %530 = vst.msk [vmem:[#allocation3] sm:$0xff] %vm405_vm2, %v527_v43 }
 0x2a6   : > { %v526_v45 = vpop.xlane.xlu1 %525 }
 0x2a7   : > { %v528_v46 = vadd.f32 %v526_v45, %v520_v44 }
 0x2a9   : > { %531 = vst.msk [vmem:[#allocation3 + $0x8] sm:$0xff] %vm405_vm2, %v528_v46 }
 0x2aa   : > { %v537_v52 = vpop.permute.xlu0 %536  ;;  %v542_v54 = vpop.permute.xlu1 %541 }
 0x2ab   : > { %v544_v55 = vmul.f32 %v537_v52, %v532_v51  ;;  %v545_v57 = vmul.f32 %v542_v54, %v533_v53 }
 0x2ac   : > { %v608_v47 = vld [vmem:[#allocation3] sm:$0xff] }
 0x2ad   : > { %915 = vrcp.f32 %v608_v47 }
 0x2b0   : > { %v609_v48 = vld [vmem:[#allocation3 + $0x8] sm:$0xff] }
 0x2b1   : > { %917 = vrcp.f32 %v609_v48 }
 0x2b7   : > { %v916_v49 = vpop.eup %915 }
 0x2b8   : > { %614 = vperm.xlu0 %903, %v916_v49  }
 0x2bb   : > { %v918_v50 = vpop.eup %917 }
 0x2bc   : > { %619 = vperm.xlu0 %903, %v918_v50  }
 0x2ed   : > { %v590_v56 = vpop.f32.mrb[0].mxu1 }
 0x2ee   : > { %v597_v58 = vadd.f32 %v590_v56, %v544_v55  ;;  %v856_v59 = vpop.f32.mrb[1].mxu1 }
 0x2ef   : > { %v593_v60 = vpop.f32.mrb[2].mxu1 }
 0x2f0   : > { %599 = vst.msk [vmem:[#allocation4] sm:$0xff] %vm410_vm0, %v597_v58  ;;  %v598_v61 = vadd.f32 %v593_v60, %v545_v57  ;;  %v857_v62 = vpop.f32.mrb[3].mxu1 }
 0x2f2   : > { %600 = vst.msk [vmem:[#allocation4 + $0x8] sm:$0xff] %vm410_vm0, %v598_v61 }
 0x2f7   : > { %v606_v63 = vld [vmem:[#allocation4] sm:$0xff] }
 0x2f9   : > { %v607_v3 = vld [vmem:[#allocation4 + $0x8] sm:$0xff] }
 0x337   : > { %v615_v0 = vpop.permute.xlu0 %614 }
 0x338   : > { %v622_v1 = vmul.f32 %v615_v0, %v606_v63 }
 0x33a   : > { %v840_v2 = vpack.c.bf16 %v622_v1, %v622_v1 }
 0x33b   : > { %v620_v4 = vpop.permute.xlu0 %619 }
 0x33c   : > { %633 = vst.msk [vmem:[%s398_s14] sm:$0xf] %vm632_vm4, %v840_v2  ;;  %v623_v5 = vmul.f32 %v620_v4, %v607_v3 }
 0x33e   : > { %v841_v6 = vpack.c.bf16 %v623_v5, %v623_v5 }
 0x340   : > { %634 = vst.msk [vmem:[%s398_s14 + $0x4] sm:$0xf] %vm632_vm4, %v841_v6 }
 0x341 PF: > { %s14_s19 = sadd.s32 1, %s957_s19   ;;  %s1078_s15 = smov %s949_s17 }
 0x342   : > { %p11_p7 = scmp.ge.s32.totalorder %s14_s19, 10   ;;  %s1079_s16 = smov %s953_s18 }
 0x343   : > { %s1080_s17 = smov %s1083_s20  ;;  %s1081_s18 = smov %s1087_s21 }
 0x344   :  { %13 = sbr.rel (!%p11_p7) target bundleno = 3 (0x3), region = 83 }

// kernel: encoder_forward.12
= control target key start
LH: loop header
LB: loop body
LE: loop exit
PB: predicated region body
PF: predicated region fallthrough
CT: control target
= control target key end

     0   :  { %s806_s21 = smov 0   ;;  %s808_s22 = smov 0   ;;  %s866_s0 = inlined_call_operand.vmem [shape: bf16[4,32,32], index: 0, kind: input, shape index: {}]   ;;  %s867_s1 = inlined_call_operand.vmem [shape: bf16[4,32,128], index: 1, kind: input, shape index: {}]   ;;  %s868_s2 = inlined_call_operand.vmem [shape: f32[1,128], index: 2, kind: input, shape index: {}]   ;;  %s869_s3 = inlined_call_operand.vmem [shape: bf16[32,128], index: 3, kind: input, shape index: {}]   ;;  %s870_s4 = inlined_call_operand.vmem [shape: f32[1,128], index: 4, kind: input, shape index: {}]   ;;  %s871_s5 = inlined_call_operand.vmem [shape: f32[1,128], index: 5, kind: input, shape index: {}]   ;;  %s872_s6 = inlined_call_operand.vmem [shape: bf16[32,128], index: 6, kind: output, shape index: {}]  }
   0x1   :  { %s810_s23 = smov 0  }
   0x2 LB: > { %s25_s24 = sadd.s32 1, %s764_s22  ;;  %p647_p0 = scmp.ge.s32.totalorder %s768_s23, 1  ;;  %s768_s23 = sphi %s810_s23, %s16_s23   ;;  %s764_s22 = sphi %s808_s22, %s874_s22   ;;  %s760_s21 = sphi %s806_s21, %s873_s21  }
   0x3   : > { %p26_p1 = scmp.ge.s32.totalorder %s25_s24, 4  ;;  %p252_p2 = scmp.lt.s32.totalorder %s768_s23, 5 }
   0x5   : > { %s876_s24 = smov (%p26_p1, %s25_s24), 0  ;;  %p253_p3 = pnand %p647_p0, %p252_p2 }
   0x6   : > { %p297_p4 = scmp.lt.s32.totalorder (!%p253_p3), %s760_s21, 3  ;;  %p652_p5 = scmp.ne.s32.totalorder (!%p253_p3), %s760_s21, 0 }
   0x7   : > { %256 = sbr.rel (%p253_p3) target bundleno = 580 (0x244), region = 44 }
   0xe   : > { %s298_s25 = scalar_select %p297_p4, %s760_s21, 3 }
   0xf   : > { %327 = sbr.rel (%p652_p5) target bundleno = 22 (0x16), region = 48  ;;  %v770_v0 = vmov (!%p652_p5), 0.0  }
  0x10   : > { %s671_s26 = sshll.u32 %s298_s25, 4  ;;  %328 = vst [vmem:[#allocation2] sm:$0xff] (!%p652_p5), %v770_v0  ;;  %329 = vst [vmem:[#allocation2 + $0x8] sm:$0xff] (!%p652_p5), %v770_v0 }
  0x11   : > { %s304_s29 = scalar_lea.vmem %s866_s0, %s671_s26  ;;  %s310_s8 = scalar_lea.vmem %s867_s1, %s671_s26  ;;  %330 = vst [vmem:[#allocation2 + $0x10] sm:$0xff] (!%p652_p5), %v770_v0  ;;  %331 = vst [vmem:[#allocation2 + $0x18] sm:$0xff] (!%p652_p5), %v770_v0 }
  0x16 PF: > { %v734_v1 = vld [vmem:[%s310_s8] sm:$0xff]   ;;  %v735_v2 = vld [vmem:[%s310_s8 + $0x8] sm:$0xff]   ;;  %vm366_vm0 = vcmask 261120   ;;  %p659_p6 = scmp.ne.s32.totalorder %s760_s21, 3 }
  0x17   : > { %701 = vmatprep.subr.bf16.mxu0 %v734_v1  ;;  %v736_v3 = vld [vmem:[%s304_s29] sm:$0xff]   ;;  %v737_v4 = vld [vmem:[%s304_s29 + $0x8] sm:$0xff]  }
  0x18   : > { %702 = vmatpush3.bf16.msra.mxu0 %v734_v1  ;;  %705 = vmatprep.mubr.msk.bf16.mxu0 %vm366_vm0, %v736_v3  ;;  %v334_v5 = vld [vmem:[#allocation2 + $0x10] sm:$0xff]  ;;  %v332_v6 = vld [vmem:[#allocation2] sm:$0xff]  ;;  %v335_v8 = vld [vmem:[#allocation2 + $0x18] sm:$0xff] }
  0x19   : > { %703 = vmatprep.subr.bf16.mxu0 %v735_v2  ;;  %v333_v11 = vld [vmem:[#allocation2 + $0x8] sm:$0xff]  ;;  %v660_v18 = vld [vmem:[%s868_s2] ss:$0 sm:$0xff] (!%p659_p6) }
  0x1a   : > { %v678_v19 = vld [vmem:[%s869_s3] sm:$0xff] (!%p659_p6)   ;;  %v695_v23 = vld [vmem:[%s869_s3 + $0x8] sm:$0xff] (!%p659_p6)  }
  0x1b   : > { %v679_v21 = vunpack.c.l.bf16 (!%p659_p6), %v678_v19  ;;  %v680_v25 = vunpack.c.h.bf16 (!%p659_p6), %v678_v19  ;;  %v683_v27 = vunpack.c.l.bf16 (!%p659_p6), %v695_v23  ;;  %v684_v30 = vunpack.c.h.bf16 (!%p659_p6), %v695_v23 }
  0x1c   : > { %704 = vmatpush3.bf16.msra.mxu0 %v735_v2  ;;  %v661_v2 = vld [vmem:[%s870_s4] ss:$0 sm:$0xff] (!%p659_p6) }
  0x1f   : > { %706 = vmatmul.mubr.msk.bf16.vlgmr.msra.gmra.mrb[0].mxu0 %vm366_vm0, %v737_v4 }
  0xf2   : > { %v707_v7 = vpop.f32.mrb[0].mxu0  ;;  %433 = sbr.rel (%p659_p6) target bundleno = 580 (0x244), region = 52 }
  0xf3   : > { %v424_v9 = vadd.f32 %v707_v7, %v334_v5  ;;  %v407_v10 = vpop.f32.mrb[1].mxu0  ;;  %v662_v7 = vld [vmem:[%s871_s5] ss:$0 sm:$0xff] (!%p659_p6) }
  0xf4   : > { %v422_v12 = vadd.f32 %v407_v10, %v332_v6  ;;  %v708_v13 = vpop.f32.mrb[2].mxu0 }
  0xf5   : > { %428 = vst [vmem:[#allocation2 + $0x10] sm:$0xff] %v424_v9  ;;  %v425_v14 = vadd.f32 %v708_v13, %v335_v8  ;;  %v410_v15 = vpop.f32.mrb[3].mxu0 }
  0xf6   : > { %426 = vst [vmem:[#allocation2] sm:$0xff] %v422_v12  ;;  %v423_v16 = vadd.f32 %v410_v15, %v333_v11 }
  0xf7   : > { %429 = vst [vmem:[#allocation2 + $0x18] sm:$0xff] %v425_v14 }
  0xf8   : > { %427 = vst [vmem:[#allocation2 + $0x8] sm:$0xff] %v423_v16 }
  0xfc   : > { %v436_v22 = vld [vmem:[#allocation2 + $0x10] sm:$0xff] }
  0xfd   : > { %v434_v17 = vld [vmem:[#allocation2] sm:$0xff]  ;;  %v447_v26 = vadd.f32 %v660_v18, %v436_v22 }
  0xfe   : > { %v445_v20 = vadd.f32 %v660_v18, %v434_v17  ;;  %v437_v29 = vld [vmem:[#allocation2 + $0x18] sm:$0xff] }
  0xff   : > { %v435_v24 = vld [vmem:[#allocation2 + $0x8] sm:$0xff]  ;;  %v448_v32 = vadd.f32 %v660_v18, %v437_v29  ;;  %v459_v33 = vadd.f32 %v683_v27, %v447_v26 }
 0x100   : > { %v446_v28 = vadd.f32 %v660_v18, %v435_v24  ;;  %v457_v31 = vadd.f32 %v679_v21, %v445_v20 }
 0x101   : > { %465 = vadd.xlane.f32.xlu1 %v459_v33  ;;  %v460_v35 = vadd.f32 %v684_v30, %v448_v32 }
 0x102   : > { %461 = vadd.xlane.f32.xlu0 %v457_v31  ;;  %v458_v34 = vadd.f32 %v680_v25, %v446_v28 }
 0x105   : > { %467 = vadd.xlane.f32.xlu1 %v460_v35 }
 0x106   : > { %463 = vadd.xlane.f32.xlu0 %v458_v34 }
 0x18e   : > { %v466_v38 = vpop.xlane.xlu1 %465 }
 0x18f   : > { %v462_v36 = vpop.xlane.xlu0 %461  ;;  %v472_v39 = vmul.f32 0.0078125, %v466_v38 }
 0x190   : > { %v470_v37 = vmul.f32 0.0078125, %v462_v36 }
 0x191   : > { %v476_v41 = vsub.f32 %v459_v33, %v472_v39 }
 0x192   : > { %v474_v40 = vsub.f32 %v457_v31, %v470_v37  ;;  %v468_v45 = vpop.xlane.xlu1 %467 }
 0x193   : > { %v464_v42 = vpop.xlane.xlu0 %463  ;;  %v473_v46 = vmul.f32 0.0078125, %v468_v45  ;;  %v480_v48 = vmul.f32 %v476_v41, %v476_v41 }
 0x194   : > { %v471_v43 = vmul.f32 0.0078125, %v464_v42  ;;  %v478_v44 = vmul.f32 %v474_v40, %v474_v40 }
 0x195   : > { %v477_v49 = vsub.f32 %v460_v35, %v473_v46 }
 0x196   : > { %v475_v47 = vsub.f32 %v458_v34, %v471_v43  ;;  %482 = vadd.xlane.f32.xlu0 %v478_v44 }
 0x197   : > { %v481_v51 = vmul.f32 %v477_v49, %v477_v49 }
 0x198   : > { %v479_v50 = vmul.f32 %v475_v47, %v475_v47 }
 0x19a   : > { %486 = vadd.xlane.f32.xlu0 %v480_v48  ;;  %484 = vadd.xlane.f32.xlu1 %v479_v50 }
 0x19e   : > { %488 = vadd.xlane.f32.xlu1 %v481_v51 }
 0x223   : > { %v483_v52 = vpop.xlane.xlu0 %482 }
 0x224   : > { %v490_v53 = vmul.f32 0.0078125, %v483_v52 }
 0x226   : > { %v494_v54 = vadd.f32 1e-05, %v490_v53 }
 0x227   : > { %v485_v55 = vpop.xlane.xlu1 %484  ;;  %v487_v56 = vpop.xlane.xlu0 %486 }
 0x228   : > { %738 = vrsqrt.f32 %v494_v54  ;;  %v491_v57 = vmul.f32 0.0078125, %v485_v55  ;;  %v492_v58 = vmul.f32 0.0078125, %v487_v56 }
 0x22a   : > { %v495_v59 = vadd.f32 1e-05, %v491_v57  ;;  %v496_v60 = vadd.f32 1e-05, %v492_v58 }
 0x22b   : > { %v489_v61 = vpop.xlane.xlu1 %488 }
 0x22c   : > { %740 = vrsqrt.f32 %v495_v59  ;;  %v493_v62 = vmul.f32 0.0078125, %v489_v61 }
 0x22d   : > { %742 = vrsqrt.f32 %v496_v60 }
 0x22e   : > { %v497_v63 = vadd.f32 1e-05, %v493_v62 }
 0x230   : > { %744 = vrsqrt.f32 %v497_v63 }
 0x232   : > { %v739_v0 = vpop.eup %738 }
 0x233   : > { %v502_v1 = vmul.f32 %v739_v0, %v474_v40 }
 0x235   : > { %v513_v5 = vmul.f32 %v661_v2, %v502_v1 }
 0x236   : > { %v741_v3 = vpop.eup %740 }
 0x237   : > { %v743_v4 = vpop.eup %742  ;;  %v503_v6 = vmul.f32 %v741_v3, %v475_v47  ;;  %v524_v11 = vadd.f32 %v662_v7, %v513_v5 }
 0x238   : > { %v504_v8 = vmul.f32 %v743_v4, %v476_v41 }
 0x239   : > { %v514_v9 = vmul.f32 %v661_v2, %v503_v6 }
 0x23a   : > { %v745_v10 = vpop.eup %744  ;;  %v515_v13 = vmul.f32 %v661_v2, %v504_v8 }
 0x23b   : > { %v525_v12 = vadd.f32 %v662_v7, %v514_v9  ;;  %v505_v14 = vmul.f32 %v745_v10, %v477_v49 }
 0x23c   : > { %v526_v17 = vadd.f32 %v662_v7, %v515_v13 }
 0x23d   : > { %v688_v15 = vpack.c.bf16 %v525_v12, %v524_v11  ;;  %v516_v16 = vmul.f32 %v661_v2, %v505_v14 }
 0x23f   : > { %689 = vst [vmem:[%s872_s6] sm:$0xff] %v688_v15   ;;  %v527_v18 = vadd.f32 %v662_v7, %v516_v16 }
 0x241   : > { %v693_v19 = vpack.c.bf16 %v527_v18, %v526_v17 }
 0x243   : > { %696 = vst [vmem:[%s872_s6 + $0x8] sm:$0xff] %v693_v19  }
 0x244 PF: > { %s16_s23 = sadd.s32 1, %s768_s23   ;;  %s873_s21 = smov %s764_s22 }
 0x245   : > { %p13_p7 = scmp.ge.s32.totalorder %s16_s23, 6   ;;  %s874_s22 = smov %s876_s24 }
 0x247   :  { %15 = sbr.rel (!%p13_p7) target bundleno = 2 (0x2), region = 88 }

// kernel: encoder_forward.10
= control target key start
LH: loop header
LB: loop body
LE: loop exit
PB: predicated region body
PF: predicated region fallthrough
CT: control target
= control target key end

     0   :  { %v772_v1 = vmov 0   ;;  %v365_v27 = vlaneseq  ;;  %vm408_vm0 = vcmask 257024   ;;  %s773_s23 = smov 96   ;;  %s774_s11 = smov 64   ;;  %s1109_s1 = inlined_call_operand.vmem [shape: bf16[128,384], index: 1, kind: input, shape index: {}]   ;;  %s1110_s0 = inlined_call_operand.vmem [shape: bf16[32,128], index: 0, kind: input, shape index: {}]   ;;  %s1111_s2 = inlined_call_operand.vmem [shape: f32[1,384], index: 2, kind: input, shape index: {}]   ;;  %s1112_s3 = inlined_call_operand.vmem [shape: bf16[4,32,32], index: 3, kind: output, shape index: {0}]   ;;  %s1113_s5 = inlined_call_operand.vmem [shape: bf16[4,32,32], index: 5, kind: output, shape index: {2}]   ;;  %s1114_s4 = inlined_call_operand.vmem [shape: bf16[4,32,32], index: 4, kind: output, shape index: {1}]  }
   0x1   :  { %v738_v0 = vld [vmem:[%s1109_s1 + $0x4] ss:$12 sps:$4 sm:$0xff]   ;;  %254 = vmatprep.mubr.bf16.mxu0 %v772_v1  ;;  %v740_v2 = vld [vmem:[%s1109_s1 + $0x8] ss:$12 sps:$4 sm:$0xff]   ;;  %v741_v3 = vld [vmem:[%s1109_s1] ss:$12 sps:$4 sm:$0xff]  }
   0x2   :  { %222 = vmatprep.subr.bf16.mxu0 %v738_v0  ;;  %714 = vmatprep.subr.bf16.mxu1 %v740_v2  ;;  %v742_v4 = vld [vmem:[%s1109_s1 + $0x1c] ss:$12 sps:$4 sm:$0xff]   ;;  %v744_v5 = vld [vmem:[%s1109_s1 + $0x20] ss:$12 sps:$4 sm:$0xff]   ;;  %v745_v6 = vld [vmem:[%s1109_s1 + $0x18] ss:$12 sps:$4 sm:$0xff]  }
   0x3   :  { %223 = vmatpush1.bf16.msra.mxu0 %v741_v3  ;;  %715 = vmatpush3.bf16.msra.mxu1 %v740_v2  ;;  %v746_v7 = vld [vmem:[%s1109_s1 + $0x34] ss:$12 sps:$4 sm:$0xff]   ;;  %v748_v8 = vld [vmem:[%s1109_s1 + $0x38] ss:$12 sps:$4 sm:$0xff]   ;;  %v749_v9 = vld [vmem:[%s1109_s1 + $0x30] ss:$12 sps:$4 sm:$0xff]  }
   0x4   :  { %224 = vmatprep.subr.bf16.mxu0 %v742_v4  ;;  %716 = vmatprep.subr.bf16.mxu1 %v744_v5  ;;  %v750_v10 = vld [vmem:[%s1109_s1 + $0x4c] ss:$12 sps:$4 sm:$0xff]   ;;  %v752_v11 = vld [vmem:[%s1109_s1 + $0x50] ss:$12 sps:$4 sm:$0xff]   ;;  %v753_v12 = vld [vmem:[%s1109_s1 + $0x48] ss:$12 sps:$4 sm:$0xff]  }
   0x5   :  { %v754_v13 = vld [vmem:[%s1109_s1 + $0x64] ss:$12 sps:$4 sm:$0xff]   ;;  %v756_v14 = vld [vmem:[%s1109_s1 + $0x68] ss:$12 sps:$4 sm:$0xff]   ;;  %v757_v15 = vld [vmem:[%s1109_s1 + $0x60] ss:$12 sps:$4 sm:$0xff]  }
   0x6   :  { %v758_v16 = vld [vmem:[%s1109_s1 + $0x7c] ss:$12 sps:$4 sm:$0xff]   ;;  %v760_v17 = vld [vmem:[%s1109_s1 + $0x80] ss:$12 sps:$4 sm:$0xff]   ;;  %v761_v19 = vld [vmem:[%s1109_s1 + $0x78] ss:$12 sps:$4 sm:$0xff]  }
   0x7   :  { %225 = vmatpush1.bf16.msra.mxu0 %v745_v6  ;;  %717 = vmatpush3.bf16.msra.mxu1 %v744_v5  ;;  %v770_v18 = vld [vmem:[%s1110_s0] sm:$0xff]   ;;  %v765_v22 = vld [vmem:[%s1109_s1 + $0x90] ss:$12 sps:$4 sm:$0xff]   ;;  %v766_v23 = vld [vmem:[%s1109_s1 + $0xac] ss:$12 sps:$4 sm:$0xff]   ;;  %v366_v28 = vshrl.u32 %v365_v27, 7 }
   0x8   :  { %226 = vmatprep.subr.bf16.mxu0 %v746_v7  ;;  %718 = vmatprep.subr.bf16.mxu1 %v748_v8  ;;  %v762_v20 = vld [vmem:[%s1109_s1 + $0x94] ss:$12 sps:$4 sm:$0xff]   ;;  %v764_v21 = vld [vmem:[%s1109_s1 + $0x98] ss:$12 sps:$4 sm:$0xff]   ;;  %v768_v24 = vld [vmem:[%s1109_s1 + $0xb0] ss:$12 sps:$4 sm:$0xff]  }
   0x9   :  { %730 = vmatprep.mubr.bf16.mxu1 %v770_v18  ;;  %v769_v25 = vld [vmem:[%s1109_s1 + $0xa8] ss:$12 sps:$4 sm:$0xff]   ;;  %v367_v29 = vsub.s32 0, %v366_v28  ;;  %v375_v30 = vsub.s32 2, %v366_v28  ;;  %v363_v31 = vld [vmem:[%s1111_s2] sm:$0x7] }
   0xa   :  { %v771_v26 = vld [vmem:[%s1110_s0 + $0x8] sm:$0xff]   ;;  %v371_v32 = vsub.s32 1, %v366_v28  ;;  %s775_s20 = smov 32  }
   0xb   :  { %227 = vmatpush1.bf16.msra.mxu0 %v749_v9  ;;  %719 = vmatpush3.bf16.msra.mxu1 %v748_v8  ;;  %v368_v33 = vrot.slane %v363_v31, %v367_v29  ;;  %v376_v34 = vrot.slane %v363_v31, %v375_v30 }
   0xc   :  { %228 = vmatprep.subr.bf16.mxu0 %v750_v10  ;;  %720 = vmatprep.subr.bf16.mxu1 %v752_v11  ;;  %v372_v35 = vrot.slane %v363_v31, %v371_v32 }
   0xf   :  { %229 = vmatpush1.bf16.msra.mxu0 %v753_v12  ;;  %721 = vmatpush3.bf16.msra.mxu1 %v752_v11 }
  0x10   :  { %230 = vmatprep.subr.bf16.mxu0 %v754_v13  ;;  %722 = vmatprep.subr.bf16.mxu1 %v756_v14 }
  0x13   :  { %231 = vmatpush1.bf16.msra.mxu0 %v757_v15  ;;  %723 = vmatpush3.bf16.msra.mxu1 %v756_v14 }
  0x14   :  { %232 = vmatprep.subr.bf16.mxu0 %v758_v16  ;;  %724 = vmatprep.subr.bf16.mxu1 %v760_v17 }
  0x17   :  { %233 = vmatpush1.bf16.msra.mxu0 %v761_v19  ;;  %725 = vmatpush3.bf16.msra.mxu1 %v760_v17 }
  0x18   :  { %234 = vmatprep.subr.bf16.mxu0 %v762_v20  ;;  %726 = vmatprep.subr.bf16.mxu1 %v764_v21 }
  0x1b   :  { %235 = vmatpush1.bf16.msra.mxu0 %v765_v22  ;;  %727 = vmatpush3.bf16.msra.mxu1 %v764_v21 }
  0x1c   :  { %236 = vmatprep.subr.bf16.mxu0 %v766_v23  ;;  %728 = vmatprep.subr.bf16.mxu1 %v768_v24 }
  0x1f   :  { %237 = vmatpush1.bf16.msra.mxu0 %v769_v25  ;;  %729 = vmatpush3.bf16.msra.mxu1 %v768_v24 }
  0x22   :  { %255 = vmatmul.mubr.bf16.vlgmr.msra.gmra.mrb[0].mxu0 %v770_v18  ;;  %731 = vmatmul.mubr.bf16.vlgmr.msra.gmra.mrb[0].mxu1 %v771_v26 }
  0x23   :  { %264 = vmatprep.mubr.bf16.mxu0 %v772_v1 }
  0x2a   :  { %265 = vmatmul.mubr.bf16.gmra.mrb[4].mxu0 %v771_v26 }
  0xf5   :  { %v256_v36 = vpop.f32.mrb[0].mxu0  ;;  %v732_v37 = vpop.f32.mrb[0].mxu1 }
  0xf6   :  { %v380_v38 = vadd.f32 %v368_v33, %v256_v36  ;;  %v388_v39 = vadd.f32 %v732_v37, %v376_v34  ;;  %v258_v40 = vpop.f32.mrb[1].mxu0  ;;  %v309_v41 = vpop.f32.mrb[1].mxu1 }
  0xf7   :  { %v381_v42 = vadd.f32 %v372_v35, %v258_v40  ;;  %v382_v43 = vadd.f32 %v376_v34, %v309_v41  ;;  %v260_v44 = vpop.f32.mrb[2].mxu0  ;;  %v733_v45 = vpop.f32.mrb[2].mxu1 }
  0xf8   :  { %v692_v46 = vpack.c.bf16 %v380_v38, %v380_v38  ;;  %v887_v47 = vpack.c.bf16 %v388_v39, %v388_v39  ;;  %v383_v48 = vadd.f32 %v368_v33, %v260_v44  ;;  %v391_v49 = vadd.f32 %v733_v45, %v376_v34  ;;  %v262_v50 = vpop.f32.mrb[3].mxu0  ;;  %v312_v51 = vpop.f32.mrb[3].mxu1 }
  0xf9   :  { %v696_v52 = vpack.c.bf16 %v381_v42, %v381_v42  ;;  %v700_v53 = vpack.c.bf16 %v382_v43, %v382_v43  ;;  %v384_v54 = vadd.f32 %v372_v35, %v262_v50  ;;  %v385_v55 = vadd.f32 %v376_v34, %v312_v51 }
  0xfa   :  { %409 = vst.msk [vmem:[%s1112_s3] sm:$0xf] %vm408_vm0, %v692_v46  ;;  %451 = vst.msk [vmem:[%s1113_s5 + $0x8] sm:$0xf] %vm408_vm0, %v887_v47  ;;  %v693_v56 = vpack.c.bf16 %v383_v48, %v383_v48  ;;  %v703_v57 = vpack.c.bf16 %v391_v49, %v391_v49  ;;  %453 = vrot.lane.b32.xlu0 %v692_v46, %s773_s23 }
  0xfb   :  { %429 = vst.msk [vmem:[%s1114_s4] sm:$0xf] %vm408_vm0, %v696_v52  ;;  %449 = vst.msk [vmem:[%s1113_s5] sm:$0xf] %vm408_vm0, %v700_v53  ;;  %v697_v58 = vpack.c.bf16 %v384_v54, %v384_v54  ;;  %v701_v59 = vpack.c.bf16 %v385_v55, %v385_v55 }
  0xfc   :  { %410 = vst.msk [vmem:[%s1112_s3 + $0x4] sm:$0xf] %vm408_vm0, %v693_v56  ;;  %452 = vst.msk [vmem:[%s1113_s5 + $0xc] sm:$0xf] %vm408_vm0, %v703_v57  ;;  %493 = vrot.lane.b32.xlu1 %v703_v57, %s773_s23 }
  0xfd   :  { %430 = vst.msk [vmem:[%s1114_s4 + $0x4] sm:$0xf] %vm408_vm0, %v697_v58  ;;  %450 = vst.msk [vmem:[%s1113_s5 + $0x4] sm:$0xf] %vm408_vm0, %v701_v59  ;;  %v266_v60 = vpop.f32.mrb[4].mxu0 }
  0xfe   :  { %491 = vrot.lane.b32.xlu0 %v887_v47, %s773_s23  ;;  %v386_v61 = vadd.f32 %v368_v33, %v266_v60  ;;  %v268_v62 = vpop.f32.mrb[5].mxu0 }
  0xff   :  { %v387_v63 = vadd.f32 %v372_v35, %v268_v62  ;;  %v270_v0 = vpop.f32.mrb[6].mxu0 }
 0x100   :  { %506 = vrot.lane.b32.xlu1 %v693_v56, %s774_s11  ;;  %v694_v1 = vpack.c.bf16 %v386_v61, %v386_v61  ;;  %v389_v2 = vadd.f32 %v368_v33, %v270_v0  ;;  %v272_v3 = vpop.f32.mrb[7].mxu0 }
 0x101   :  { %v698_v4 = vpack.c.bf16 %v387_v63, %v387_v63  ;;  %v390_v5 = vadd.f32 %v372_v35, %v272_v3 }
 0x102   :  { %504 = vrot.lane.b32.xlu0 %v692_v46, %s774_s11  ;;  %411 = vst.msk [vmem:[%s1112_s3 + $0x8] sm:$0xf] %vm408_vm0, %v694_v1  ;;  %v695_v6 = vpack.c.bf16 %v389_v2, %v389_v2 }
 0x103   :  { %431 = vst.msk [vmem:[%s1114_s4 + $0x8] sm:$0xf] %vm408_vm0, %v698_v4  ;;  %v699_v7 = vpack.c.bf16 %v390_v5, %v390_v5 }
 0x104   :  { %544 = vrot.lane.b32.xlu1 %v703_v57, %s774_s11  ;;  %412 = vst.msk [vmem:[%s1112_s3 + $0xc] sm:$0xf] %vm408_vm0, %v695_v6 }
 0x105   :  { %432 = vst.msk [vmem:[%s1114_s4 + $0xc] sm:$0xf] %vm408_vm0, %v699_v7 }
 0x106   :  { %542 = vrot.lane.b32.xlu0 %v887_v47, %s774_s11 }
 0x108   :  { %557 = vrot.lane.b32.xlu1 %v693_v56, %s775_s20 }
 0x10a   :  { %555 = vrot.lane.b32.xlu0 %v692_v46, %s775_s20 }
 0x10c   :  { %472 = vrot.lane.b32.xlu1 %v697_v58, %s773_s23 }
 0x10e   :  { %470 = vrot.lane.b32.xlu0 %v696_v52, %s773_s23 }
 0x110   :  { %489 = vrot.lane.b32.xlu1 %v701_v59, %s773_s23 }
 0x112   :  { %487 = vrot.lane.b32.xlu0 %v700_v53, %s773_s23 }
 0x114   :  { %523 = vrot.lane.b32.xlu1 %v697_v58, %s774_s11 }
 0x116   :  { %521 = vrot.lane.b32.xlu0 %v696_v52, %s774_s11 }
 0x118   :  { %540 = vrot.lane.b32.xlu1 %v701_v59, %s774_s11 }
 0x11a   :  { %538 = vrot.lane.b32.xlu0 %v700_v53, %s774_s11 }
 0x11c   :  { %574 = vrot.lane.b32.xlu1 %v697_v58, %s775_s20 }
 0x11e   :  { %572 = vrot.lane.b32.xlu0 %v696_v52, %s775_s20 }
 0x120   :  { %591 = vrot.lane.b32.xlu1 %v701_v59, %s775_s20 }
 0x122   :  { %589 = vrot.lane.b32.xlu0 %v700_v53, %s775_s20 }
 0x124   :  { %457 = vrot.lane.b32.xlu1 %v694_v1, %s773_s23 }
 0x126   :  { %455 = vrot.lane.b32.xlu0 %v693_v56, %s773_s23 }
 0x128   :  { %459 = vrot.lane.b32.xlu1 %v695_v6, %s773_s23 }
 0x12a   :  { %508 = vrot.lane.b32.xlu0 %v694_v1, %s774_s11 }
 0x12c   :  { %510 = vrot.lane.b32.xlu1 %v695_v6, %s774_s11 }
 0x12e   :  { %559 = vrot.lane.b32.xlu0 %v694_v1, %s775_s20 }
 0x130   :  { %561 = vrot.lane.b32.xlu1 %v695_v6, %s775_s20 }
 0x132   :  { %474 = vrot.lane.b32.xlu0 %v698_v4, %s773_s23 }
 0x134   :  { %476 = vrot.lane.b32.xlu1 %v699_v7, %s773_s23 }
 0x136   :  { %525 = vrot.lane.b32.xlu0 %v698_v4, %s774_s11 }
 0x138   :  { %527 = vrot.lane.b32.xlu1 %v699_v7, %s774_s11 }
 0x13a   :  { %576 = vrot.lane.b32.xlu0 %v698_v4, %s775_s20 }
 0x13c   :  { %578 = vrot.lane.b32.xlu1 %v699_v7, %s775_s20 }
 0x13e   :  { %593 = vrot.lane.b32.xlu0 %v887_v47, %s775_s20 }
 0x140   :  { %595 = vrot.lane.b32.xlu1 %v703_v57, %s775_s20 }
 0x16c   :  { %v454_v8 = vpop.permute.xlu0 %453 }
 0x16d   :  { %656 = vst.msk [vmem:[%s1112_s3 + $0x10] sm:$0xf] %vm408_vm0, %v454_v8 }
 0x16e   :  { %v494_v9 = vpop.permute.xlu1 %493 }
 0x16f   :  { %667 = vst.msk [vmem:[%s1113_s5 + $0x1c] sm:$0xf] %vm408_vm0, %v494_v9 }
 0x170   :  { %v492_v10 = vpop.permute.xlu0 %491 }
 0x171   :  { %666 = vst.msk [vmem:[%s1113_s5 + $0x18] sm:$0xf] %vm408_vm0, %v492_v10 }
 0x172   :  { %v507_v11 = vpop.permute.xlu1 %506 }
 0x173   :  { %669 = vst.msk [vmem:[%s1112_s3 + $0x24] sm:$0xf] %vm408_vm0, %v507_v11 }
 0x174   :  { %v505_v12 = vpop.permute.xlu0 %504 }
 0x175   :  { %668 = vst.msk [vmem:[%s1112_s3 + $0x20] sm:$0xf] %vm408_vm0, %v505_v12 }
 0x176   :  { %v545_v13 = vpop.permute.xlu1 %544 }
 0x177   :  { %679 = vst.msk [vmem:[%s1113_s5 + $0x2c] sm:$0xf] %vm408_vm0, %v545_v13 }
 0x178   :  { %v543_v14 = vpop.permute.xlu0 %542 }
 0x179   :  { %678 = vst.msk [vmem:[%s1113_s5 + $0x28] sm:$0xf] %vm408_vm0, %v543_v14 }
 0x17a   :  { %v558_v15 = vpop.permute.xlu1 %557 }
 0x17b   :  { %681 = vst.msk [vmem:[%s1112_s3 + $0x34] sm:$0xf] %vm408_vm0, %v558_v15 }
 0x17c   :  { %v556_v16 = vpop.permute.xlu0 %555 }
 0x17d   :  { %680 = vst.msk [vmem:[%s1112_s3 + $0x30] sm:$0xf] %vm408_vm0, %v556_v16 }
 0x17e   :  { %v473_v17 = vpop.permute.xlu1 %472 }
 0x17f   :  { %661 = vst.msk [vmem:[%s1114_s4 + $0x14] sm:$0xf] %vm408_vm0, %v473_v17 }
 0x180   :  { %v471_v18 = vpop.permute.xlu0 %470 }
 0x181   :  { %660 = vst.msk [vmem:[%s1114_s4 + $0x10] sm:$0xf] %vm408_vm0, %v471_v18 }
 0x182   :  { %v490_v19 = vpop.permute.xlu1 %489 }
 0x183   :  { %665 = vst.msk [vmem:[%s1113_s5 + $0x14] sm:$0xf] %vm408_vm0, %v490_v19 }
 0x184   :  { %v488_v20 = vpop.permute.xlu0 %487 }
 0x185   :  { %664 = vst.msk [vmem:[%s1113_s5 + $0x10] sm:$0xf] %vm408_vm0, %v488_v20 }
 0x186   :  { %v524_v21 = vpop.permute.xlu1 %523 }
 0x187   :  { %673 = vst.msk [vmem:[%s1114_s4 + $0x24] sm:$0xf] %vm408_vm0, %v524_v21 }
 0x188   :  { %v522_v22 = vpop.permute.xlu0 %521 }
 0x189   :  { %672 = vst.msk [vmem:[%s1114_s4 + $0x20] sm:$0xf] %vm408_vm0, %v522_v22 }
 0x18a   :  { %v541_v23 = vpop.permute.xlu1 %540 }
 0x18b   :  { %677 = vst.msk [vmem:[%s1113_s5 + $0x24] sm:$0xf] %vm408_vm0, %v541_v23 }
 0x18c   :  { %v539_v24 = vpop.permute.xlu0 %538 }
 0x18d   :  { %676 = vst.msk [vmem:[%s1113_s5 + $0x20] sm:$0xf] %vm408_vm0, %v539_v24 }
 0x18e   :  { %v575_v25 = vpop.permute.xlu1 %574 }
 0x18f   :  { %685 = vst.msk [vmem:[%s1114_s4 + $0x34] sm:$0xf] %vm408_vm0, %v575_v25 }
 0x190   :  { %v573_v26 = vpop.permute.xlu0 %572 }
 0x191   :  { %684 = vst.msk [vmem:[%s1114_s4 + $0x30] sm:$0xf] %vm408_vm0, %v573_v26 }
 0x192   :  { %v592_v27 = vpop.permute.xlu1 %591 }
 0x193   :  { %689 = vst.msk [vmem:[%s1113_s5 + $0x34] sm:$0xf] %vm408_vm0, %v592_v27 }
 0x194   :  { %v590_v28 = vpop.permute.xlu0 %589 }
 0x195   :  { %688 = vst.msk [vmem:[%s1113_s5 + $0x30] sm:$0xf] %vm408_vm0, %v590_v28 }
 0x196   :  { %v458_v29 = vpop.permute.xlu1 %457 }
 0x197   :  { %658 = vst.msk [vmem:[%s1112_s3 + $0x18] sm:$0xf] %vm408_vm0, %v458_v29 }
 0x198   :  { %v456_v30 = vpop.permute.xlu0 %455 }
 0x199   :  { %657 = vst.msk [vmem:[%s1112_s3 + $0x14] sm:$0xf] %vm408_vm0, %v456_v30 }
 0x19a   :  { %v460_v31 = vpop.permute.xlu1 %459 }
 0x19b   :  { %659 = vst.msk [vmem:[%s1112_s3 + $0x1c] sm:$0xf] %vm408_vm0, %v460_v31 }
 0x19c   :  { %v509_v32 = vpop.permute.xlu0 %508 }
 0x19d   :  { %670 = vst.msk [vmem:[%s1112_s3 + $0x28] sm:$0xf] %vm408_vm0, %v509_v32 }
 0x19e   :  { %v511_v33 = vpop.permute.xlu1 %510 }
 0x19f   :  { %671 = vst.msk [vmem:[%s1112_s3 + $0x2c] sm:$0xf] %vm408_vm0, %v511_v33 }
 0x1a0   :  { %v560_v34 = vpop.permute.xlu0 %559 }
 0x1a1   :  { %682 = vst.msk [vmem:[%s1112_s3 + $0x38] sm:$0xf] %vm408_vm0, %v560_v34 }
 0x1a2   :  { %v562_v35 = vpop.permute.xlu1 %561 }
 0x1a3   :  { %683 = vst.msk [vmem:[%s1112_s3 + $0x3c] sm:$0xf] %vm408_vm0, %v562_v35 }
 0x1a4   :  { %v475_v36 = vpop.permute.xlu0 %474 }
 0x1a5   :  { %662 = vst.msk [vmem:[%s1114_s4 + $0x18] sm:$0xf] %vm408_vm0, %v475_v36 }
 0x1a6   :  { %v477_v37 = vpop.permute.xlu1 %476 }
 0x1a7   :  { %663 = vst.msk [vmem:[%s1114_s4 + $0x1c] sm:$0xf] %vm408_vm0, %v477_v37 }
 0x1a8   :  { %v526_v38 = vpop.permute.xlu0 %525 }
 0x1a9   :  { %674 = vst.msk [vmem:[%s1114_s4 + $0x28] sm:$0xf] %vm408_vm0, %v526_v38 }
 0x1aa   :  { %v528_v39 = vpop.permute.xlu1 %527 }
 0x1ab   :  { %675 = vst.msk [vmem:[%s1114_s4 + $0x2c] sm:$0xf] %vm408_vm0, %v528_v39 }
 0x1ac   :  { %v577_v40 = vpop.permute.xlu0 %576 }
 0x1ad   :  { %686 = vst.msk [vmem:[%s1114_s4 + $0x38] sm:$0xf] %vm408_vm0, %v577_v40 }
 0x1ae   :  { %v579_v41 = vpop.permute.xlu1 %578 }
 0x1af   :  { %687 = vst.msk [vmem:[%s1114_s4 + $0x3c] sm:$0xf] %vm408_vm0, %v579_v41 }
 0x1b0   :  { %v594_v42 = vpop.permute.xlu0 %593 }
 0x1b1   :  { %690 = vst.msk [vmem:[%s1113_s5 + $0x38] sm:$0xf] %vm408_vm0, %v594_v42 }
 0x1b2   :  { %v596_v43 = vpop.permute.xlu1 %595 }
 0x1b3   :  { %691 = vst.msk [vmem:[%s1113_s5 + $0x3c] sm:$0xf] %vm408_vm0, %v596_v43 }

// kernel: encoder_forward.13
= control target key start
LH: loop header
LB: loop body
LE: loop exit
PB: predicated region body
PF: predicated region fallthrough
CT: control target
= control target key end

     0   :  { %v678_v1 = vmov 0   ;;  %v57_v35 = vlaneseq  ;;  %s845_s1 = inlined_call_operand.vmem [shape: bf16[128,256], index: 1, kind: input, shape index: {}]   ;;  %s846_s0 = inlined_call_operand.vmem [shape: bf16[32,128], index: 0, kind: input, shape index: {}]   ;;  %s847_s3 = inlined_call_operand.vmem [shape: bf16[256,128], index: 3, kind: input, shape index: {}]   ;;  %s848_s2 = inlined_call_operand.vmem [shape: f32[1,256], index: 2, kind: input, shape index: {}]   ;;  %s849_s4 = inlined_call_operand.vmem [shape: f32[1,128], index: 4, kind: input, shape index: {}]   ;;  %s850_s5 = inlined_call_operand.vmem [shape: f32[1,128], index: 5, kind: input, shape index: {}]   ;;  %s851_s6 = inlined_call_operand.vmem [shape: f32[1,128], index: 6, kind: input, shape index: {}]   ;;  %s852_s7 = inlined_call_operand.vmem [shape: bf16[32,128], index: 7, kind: output, shape index: {}]  }
   0x1   :  { %v628_v0 = vld [vmem:[%s845_s1 + $0x4] ss:$8 sps:$4 sm:$0xff]   ;;  %191 = vmatprep.mubr.bf16.mxu0 %v678_v1  ;;  %v630_v2 = vld [vmem:[%s845_s1] ss:$8 sps:$4 sm:$0xff]   ;;  %v631_v3 = vld [vmem:[%s845_s1 + $0x14] ss:$8 sps:$4 sm:$0xff]  }
   0x2   :  { %159 = vmatprep.subr.bf16.mxu0 %v628_v0  ;;  %v633_v4 = vld [vmem:[%s845_s1 + $0x10] ss:$8 sps:$4 sm:$0xff]   ;;  %v634_v5 = vld [vmem:[%s845_s1 + $0x24] ss:$8 sps:$4 sm:$0xff]   ;;  %v636_v6 = vld [vmem:[%s845_s1 + $0x20] ss:$8 sps:$4 sm:$0xff]  }
   0x3   :  { %160 = vmatpush1.bf16.msra.mxu0 %v630_v2  ;;  %v637_v7 = vld [vmem:[%s845_s1 + $0x34] ss:$8 sps:$4 sm:$0xff]   ;;  %v639_v8 = vld [vmem:[%s845_s1 + $0x30] ss:$8 sps:$4 sm:$0xff]   ;;  %v640_v9 = vld [vmem:[%s845_s1 + $0x44] ss:$8 sps:$4 sm:$0xff]  }
   0x4   :  { %161 = vmatprep.subr.bf16.mxu0 %v631_v3  ;;  %v642_v10 = vld [vmem:[%s845_s1 + $0x40] ss:$8 sps:$4 sm:$0xff]   ;;  %v643_v12 = vld [vmem:[%s845_s1 + $0x54] ss:$8 sps:$4 sm:$0xff]   ;;  %v645_v17 = vld [vmem:[%s845_s1 + $0x50] ss:$8 sps:$4 sm:$0xff]  }
   0x5   :  { %v654_v11 = vld [vmem:[%s847_s3 + $0x40] sm:$0xff]   ;;  %v656_v14 = vld [vmem:[%s847_s3 + $0x48] sm:$0xff]   ;;  %v658_v16 = vld [vmem:[%s847_s3 + $0x50] sm:$0xff]   ;;  %v58_v36 = vshrl.u32 %v57_v35, 7 }
   0x6   :  { %v655_v13 = vld [vmem:[%s847_s3] sm:$0xff]   ;;  %599 = vmatprep.subr.bf16.mxu1 %v654_v11  ;;  %v657_v15 = vld [vmem:[%s847_s3 + $0x8] sm:$0xff]   ;;  %v659_v19 = vld [vmem:[%s847_s3 + $0x10] sm:$0xff]  }
   0x7   :  { %162 = vmatpush1.bf16.msra.mxu0 %v633_v4  ;;  %600 = vmatpush3.bf16.msra.mxu1 %v655_v13  ;;  %v646_v18 = vld [vmem:[%s845_s1 + $0x64] ss:$8 sps:$4 sm:$0xff]   ;;  %v648_v20 = vld [vmem:[%s845_s1 + $0x60] ss:$8 sps:$4 sm:$0xff]   ;;  %v660_v21 = vld [vmem:[%s847_s3 + $0x58] sm:$0xff]   ;;  %v59_v37 = vsub.s32 0, %v58_v36 }
   0x8   :  { %163 = vmatprep.subr.bf16.mxu0 %v634_v5  ;;  %601 = vmatprep.subr.bf16.mxu1 %v656_v14  ;;  %v649_v22 = vld [vmem:[%s845_s1 + $0x74] ss:$8 sps:$4 sm:$0xff]   ;;  %v662_v24 = vld [vmem:[%s847_s3 + $0x60] sm:$0xff]   ;;  %v651_v25 = vld [vmem:[%s845_s1 + $0x70] ss:$8 sps:$4 sm:$0xff]   ;;  %v63_v39 = vsub.s32 1, %v58_v36 }
   0x9   :  { %v661_v23 = vld [vmem:[%s847_s3 + $0x18] sm:$0xff]   ;;  %v663_v26 = vld [vmem:[%s847_s3 + $0x20] sm:$0xff]   ;;  %v664_v27 = vld [vmem:[%s847_s3 + $0x68] sm:$0xff]  }
   0xa   :  { %v652_v28 = vld [vmem:[%s846_s0] sm:$0xff]   ;;  %v653_v29 = vld [vmem:[%s846_s0 + $0x8] sm:$0xff]   ;;  %v666_v31 = vld [vmem:[%s847_s3 + $0x70] sm:$0xff]  }
   0xb   :  { %164 = vmatpush1.bf16.msra.mxu0 %v636_v6  ;;  %602 = vmatpush3.bf16.msra.mxu1 %v657_v15  ;;  %v665_v30 = vld [vmem:[%s847_s3 + $0x28] sm:$0xff]   ;;  %v667_v32 = vld [vmem:[%s847_s3 + $0x30] sm:$0xff]   ;;  %v668_v33 = vld [vmem:[%s847_s3 + $0x78] sm:$0xff]  }
   0xc   :  { %165 = vmatprep.subr.bf16.mxu0 %v637_v7  ;;  %603 = vmatprep.subr.bf16.mxu1 %v658_v16  ;;  %v669_v34 = vld [vmem:[%s847_s3 + $0x38] sm:$0xff]   ;;  %v55_v38 = vld [vmem:[%s848_s2] sm:$0x3] }
   0xd   :  { %v60_v40 = vrot.slane %v55_v38, %v59_v37  ;;  %v64_v41 = vrot.slane %v55_v38, %v63_v39  ;;  %v580_v6 = vld [vmem:[%s846_s0] sm:$0xff]  }
   0xf   :  { %166 = vmatpush1.bf16.msra.mxu0 %v639_v8  ;;  %604 = vmatpush3.bf16.msra.mxu1 %v659_v19  ;;  %v597_v19 = vld [vmem:[%s846_s0 + $0x8] sm:$0xff]  }
  0x10   :  { %167 = vmatprep.subr.bf16.mxu0 %v640_v9  ;;  %605 = vmatprep.subr.bf16.mxu1 %v660_v21  ;;  %v568_v9 = vld [vmem:[%s849_s4] ss:$0 sm:$0xff] }
  0x13   :  { %168 = vmatpush1.bf16.msra.mxu0 %v642_v10  ;;  %606 = vmatpush3.bf16.msra.mxu1 %v661_v23 }
  0x14   :  { %169 = vmatprep.subr.bf16.mxu0 %v643_v12  ;;  %607 = vmatprep.subr.bf16.mxu1 %v662_v24  ;;  %v581_v12 = vunpack.c.l.bf16 %v580_v6 }
  0x17   :  { %170 = vmatpush1.bf16.msra.mxu0 %v645_v17  ;;  %608 = vmatpush3.bf16.msra.mxu1 %v663_v26 }
  0x18   :  { %171 = vmatprep.subr.bf16.mxu0 %v646_v18  ;;  %609 = vmatprep.subr.bf16.mxu1 %v664_v27  ;;  %v582_v18 = vunpack.c.h.bf16 %v580_v6 }
  0x1b   :  { %172 = vmatpush1.bf16.msra.mxu0 %v648_v20  ;;  %610 = vmatpush3.bf16.msra.mxu1 %v665_v30 }
  0x1c   :  { %173 = vmatprep.subr.bf16.mxu0 %v649_v22  ;;  %611 = vmatprep.subr.bf16.mxu1 %v666_v31  ;;  %v586_v31 = vunpack.c.h.bf16 %v597_v19 }
  0x1f   :  { %174 = vmatpush1.bf16.msra.mxu0 %v651_v25  ;;  %612 = vmatpush3.bf16.msra.mxu1 %v667_v32  ;;  %v585_v25 = vunpack.c.l.bf16 %v597_v19 }
  0x20   :  { %613 = vmatprep.subr.bf16.mxu1 %v668_v33 }
  0x22   :  { %192 = vmatmul.mubr.bf16.vlgmr.msra.gmra.mrb[0].mxu0 %v652_v28 }
  0x23   :  { %201 = vmatprep.mubr.bf16.mxu0 %v678_v1  ;;  %614 = vmatpush3.bf16.msra.mxu1 %v669_v34 }
  0x2a   :  { %202 = vmatmul.mubr.bf16.gmra.mrb[4].mxu0 %v653_v29 }
  0xf5   :  { %v193_v42 = vpop.f32.mrb[0].mxu0 }
  0xf6   :  { %v194_v43 = vadd.f32 %v193_v42, %v60_v40  ;;  %v195_v44 = vpop.f32.mrb[1].mxu0 }
  0xf7   :  { %v196_v45 = vadd.f32 %v195_v44, %v64_v41  ;;  %v197_v46 = vpop.f32.mrb[2].mxu0 }
  0xf8   :  { %v198_v47 = vadd.f32 %v197_v46, %v60_v40  ;;  %v199_v48 = vpop.f32.mrb[3].mxu0  ;;  %v212_v50 = vmax.f32 %v194_v43, 0.0 }
  0xf9   :  { %v200_v49 = vadd.f32 %v199_v48, %v64_v41  ;;  %v213_v52 = vmax.f32 %v196_v45, 0.0 }
  0xfa   :  { %v214_v51 = vmax.f32 %v198_v47, 0.0 }
  0xfb   :  { %v215_v53 = vmax.f32 %v200_v49, 0.0 }
  0xfc   :  { %v224_v54 = vpack.c.bf16 %v214_v51, %v212_v50 }
  0xfd   :  { %v203_v55 = vpop.f32.mrb[4].mxu0  ;;  %v225_v56 = vpack.c.bf16 %v215_v53, %v213_v52 }
  0xfe   :  { %v204_v57 = vadd.f32 %v203_v55, %v60_v40  ;;  %v205_v58 = vpop.f32.mrb[5].mxu0 }
  0xff   :  { %v206_v59 = vadd.f32 %v205_v58, %v64_v41  ;;  %v207_v60 = vpop.f32.mrb[6].mxu0  ;;  %388 = vmatprep.mubr.bf16.mxu1 %v225_v56 }
 0x100   :  { %v208_v61 = vadd.f32 %v207_v60, %v60_v40  ;;  %v209_v62 = vpop.f32.mrb[7].mxu0  ;;  %389 = vmatmul.mubr.bf16.vlgmr.msra.gmra.mrb[0].mxu1 %v224_v54  ;;  %v216_v0 = vmax.f32 %v204_v57, 0.0 }
 0x101   :  { %v210_v63 = vadd.f32 %v209_v62, %v64_v41  ;;  %v217_v2 = vmax.f32 %v206_v59, 0.0 }
 0x102   :  { %v218_v1 = vmax.f32 %v208_v61, 0.0 }
 0x103   :  { %v219_v3 = vmax.f32 %v210_v63, 0.0  ;;  %v569_v63 = vld [vmem:[%s850_s5] ss:$0 sm:$0xff] }
 0x104   :  { %v226_v4 = vpack.c.bf16 %v218_v1, %v216_v0 }
 0x105   :  { %v227_v5 = vpack.c.bf16 %v219_v3, %v217_v2  ;;  %v570_v3 = vld [vmem:[%s851_s6] ss:$0 sm:$0xff] }
 0x107   :  { %396 = vmatprep.mubr.bf16.mxu1 %v227_v5 }
 0x108   :  { %397 = vmatmul.mubr.bf16.gmra.mrb[4].mxu1 %v226_v4 }
 0x1d3   :  { %v615_v7 = vpop.f32.mrb[0].mxu1 }
 0x1d4   :  { %v616_v8 = vpop.f32.mrb[1].mxu1 }
 0x1d5   :  { %v617_v10 = vadd.f32 %v616_v8, %v615_v7  ;;  %v618_v11 = vpop.f32.mrb[2].mxu1 }
 0x1d6   :  { %v619_v13 = vpop.f32.mrb[3].mxu1 }
 0x1d7   :  { %v427_v14 = vadd.f32 %v617_v10, %v568_v9  ;;  %v620_v15 = vadd.f32 %v619_v13, %v618_v11 }
 0x1d9   :  { %v428_v16 = vadd.f32 %v620_v15, %v568_v9  ;;  %v439_v17 = vadd.f32 %v581_v12, %v427_v14 }
 0x1db   :  { %v621_v20 = vpop.f32.mrb[4].mxu1  ;;  %443 = vadd.xlane.f32.xlu0 %v439_v17  ;;  %v440_v24 = vadd.f32 %v582_v18, %v428_v16 }
 0x1dc   :  { %v622_v21 = vpop.f32.mrb[5].mxu1 }
 0x1dd   :  { %v623_v22 = vadd.f32 %v622_v21, %v621_v20  ;;  %v624_v23 = vpop.f32.mrb[6].mxu1 }
 0x1de   :  { %v625_v26 = vpop.f32.mrb[7].mxu1 }
 0x1df   :  { %v429_v27 = vadd.f32 %v623_v22, %v568_v9  ;;  %v626_v28 = vadd.f32 %v625_v26, %v624_v23  ;;  %445 = vadd.xlane.f32.xlu0 %v440_v24 }
 0x1e1   :  { %v430_v29 = vadd.f32 %v626_v28, %v568_v9  ;;  %v441_v30 = vadd.f32 %v585_v25, %v429_v27 }
 0x1e3   :  { %447 = vadd.xlane.f32.xlu1 %v441_v30  ;;  %v442_v32 = vadd.f32 %v586_v31, %v430_v29 }
 0x1e7   :  { %449 = vadd.xlane.f32.xlu1 %v442_v32 }
 0x268   :  { %v444_v33 = vpop.xlane.xlu0 %443 }
 0x269   :  { %v452_v34 = vmul.f32 0.0078125, %v444_v33 }
 0x26b   :  { %v456_v35 = vsub.f32 %v439_v17, %v452_v34 }
 0x26c   :  { %v446_v36 = vpop.xlane.xlu0 %445 }
 0x26d   :  { %v453_v37 = vmul.f32 0.0078125, %v446_v36  ;;  %v460_v38 = vmul.f32 %v456_v35, %v456_v35 }
 0x26f   :  { %v457_v39 = vsub.f32 %v440_v24, %v453_v37  ;;  %464 = vadd.xlane.f32.xlu0 %v460_v38 }
 0x270   :  { %v448_v40 = vpop.xlane.xlu1 %447 }
 0x271   :  { %v454_v41 = vmul.f32 0.0078125, %v448_v40  ;;  %v461_v42 = vmul.f32 %v457_v39, %v457_v39 }
 0x273   :  { %v458_v43 = vsub.f32 %v441_v30, %v454_v41  ;;  %466 = vadd.xlane.f32.xlu1 %v461_v42 }
 0x274   :  { %v450_v44 = vpop.xlane.xlu1 %449 }
 0x275   :  { %v455_v45 = vmul.f32 0.0078125, %v450_v44  ;;  %v462_v46 = vmul.f32 %v458_v43, %v458_v43 }
 0x277   :  { %v459_v47 = vsub.f32 %v442_v32, %v455_v45  ;;  %468 = vadd.xlane.f32.xlu0 %v462_v46 }
 0x279   :  { %v463_v48 = vmul.f32 %v459_v47, %v459_v47 }
 0x27b   :  { %470 = vadd.xlane.f32.xlu1 %v463_v48 }
 0x2fc   :  { %v465_v49 = vpop.xlane.xlu0 %464 }
 0x2fd   :  { %v472_v50 = vmul.f32 0.0078125, %v465_v49 }
 0x2ff   :  { %v476_v51 = vadd.f32 1e-05, %v472_v50 }
 0x300   :  { %v467_v52 = vpop.xlane.xlu1 %466 }
 0x301   :  { %670 = vrsqrt.f32 %v476_v51  ;;  %v473_v53 = vmul.f32 0.0078125, %v467_v52 }
 0x303   :  { %v477_v54 = vadd.f32 1e-05, %v473_v53 }
 0x304   :  { %v469_v55 = vpop.xlane.xlu0 %468 }
 0x305   :  { %672 = vrsqrt.f32 %v477_v54  ;;  %v474_v56 = vmul.f32 0.0078125, %v469_v55 }
 0x307   :  { %v478_v57 = vadd.f32 1e-05, %v474_v56 }
 0x308   :  { %v471_v58 = vpop.xlane.xlu1 %470 }
 0x309   :  { %674 = vrsqrt.f32 %v478_v57  ;;  %v475_v59 = vmul.f32 0.0078125, %v471_v58 }
 0x30b   :  { %v671_v60 = vpop.eup %670  ;;  %v479_v61 = vadd.f32 1e-05, %v475_v59 }
 0x30c   :  { %v484_v62 = vmul.f32 %v671_v60, %v456_v35 }
 0x30d   :  { %676 = vrsqrt.f32 %v479_v61 }
 0x30e   :  { %v495_v1 = vmul.f32 %v569_v63, %v484_v62 }
 0x30f   :  { %v673_v0 = vpop.eup %672 }
 0x310   :  { %v485_v2 = vmul.f32 %v673_v0, %v457_v39  ;;  %v506_v6 = vadd.f32 %v570_v3, %v495_v1 }
 0x312   :  { %v496_v4 = vmul.f32 %v569_v63, %v485_v2 }
 0x313   :  { %v675_v5 = vpop.eup %674 }
 0x314   :  { %v507_v7 = vadd.f32 %v570_v3, %v496_v4  ;;  %v486_v8 = vmul.f32 %v675_v5, %v458_v43 }
 0x316   :  { %v590_v9 = vpack.c.bf16 %v507_v7, %v506_v6  ;;  %v497_v11 = vmul.f32 %v569_v63, %v486_v8 }
 0x317   :  { %v677_v10 = vpop.eup %676 }
 0x318   :  { %591 = vst [vmem:[%s852_s7] sm:$0xff] %v590_v9   ;;  %v487_v12 = vmul.f32 %v677_v10, %v459_v47  ;;  %v508_v14 = vadd.f32 %v570_v3, %v497_v11 }
 0x31a   :  { %v498_v13 = vmul.f32 %v569_v63, %v487_v12 }
 0x31c   :  { %v509_v15 = vadd.f32 %v570_v3, %v498_v13 }
 0x31e   :  { %v595_v16 = vpack.c.bf16 %v509_v15, %v508_v14 }
 0x320   :  { %598 = vst [vmem:[%s852_s7 + $0x8] sm:$0xff] %v595_v16  }

// kernel: encoder_forward.17
= control target key start
LH: loop header
LB: loop body
LE: loop exit
PB: predicated region body
PF: predicated region fallthrough
CT: control target
= control target key end

     0   :  { %v718_v2 = vmov 0   ;;  %s894_s0 = inlined_call_operand.vmem [shape: bf16[32,128], index: 0, kind: input, shape index: {}]   ;;  %s895_s1 = inlined_call_operand.vmem [shape: bf16[128,256], index: 1, kind: input, shape index: {}]   ;;  %s896_s2 = inlined_call_operand.vmem [shape: f32[1,256], index: 2, kind: input, shape index: {}]   ;;  %s897_s3 = inlined_call_operand.vmem [shape: bf16[256,128], index: 3, kind: input, shape index: {}]   ;;  %s898_s4 = inlined_call_operand.vmem [shape: f32[1,128], index: 4, kind: input, shape index: {}]   ;;  %s899_s5 = inlined_call_operand.vmem [shape: f32[1,128], index: 5, kind: input, shape index: {}]   ;;  %s900_s6 = inlined_call_operand.vmem [shape: f32[1,128], index: 6, kind: input, shape index: {}]   ;;  %s901_s7 = inlined_call_operand.hbm [shape: bf16[32,128], index: 7, kind: output, shape index: {}]  }
   0x1   :  { %v644_v0 = vld [vmem:[%s895_s1 + $0x4] ss:$8 sps:$4 sm:$0xff]   ;;  %v646_v1 = vld [vmem:[%s895_s1] ss:$8 sps:$4 sm:$0xff]   ;;  %192 = vmatprep.mubr.bf16.mxu0 %v718_v2  ;;  %v647_v3 = vld [vmem:[%s895_s1 + $0x14] ss:$8 sps:$4 sm:$0xff]  }
   0x2   :  { %160 = vmatprep.subr.bf16.mxu0 %v644_v0  ;;  %v649_v4 = vld [vmem:[%s895_s1 + $0x10] ss:$8 sps:$4 sm:$0xff]   ;;  %v650_v5 = vld [vmem:[%s895_s1 + $0x24] ss:$8 sps:$4 sm:$0xff]   ;;  %v652_v6 = vld [vmem:[%s895_s1 + $0x20] ss:$8 sps:$4 sm:$0xff]  }
   0x3   :  { %161 = vmatpush1.bf16.msra.mxu0 %v646_v1  ;;  %v653_v7 = vld [vmem:[%s895_s1 + $0x34] ss:$8 sps:$4 sm:$0xff]   ;;  %v655_v8 = vld [vmem:[%s895_s1 + $0x30] ss:$8 sps:$4 sm:$0xff]   ;;  %v656_v9 = vld [vmem:[%s895_s1 + $0x44] ss:$8 sps:$4 sm:$0xff]  }
   0x4   :  { %162 = vmatprep.subr.bf16.mxu0 %v647_v3  ;;  %v658_v10 = vld [vmem:[%s895_s1 + $0x40] ss:$8 sps:$4 sm:$0xff]   ;;  %v659_v12 = vld [vmem:[%s895_s1 + $0x54] ss:$8 sps:$4 sm:$0xff]   ;;  %v661_v17 = vld [vmem:[%s895_s1 + $0x50] ss:$8 sps:$4 sm:$0xff]  }
   0x5   :  { %v670_v11 = vld [vmem:[%s897_s3 + $0x40] sm:$0xff]   ;;  %v672_v14 = vld [vmem:[%s897_s3 + $0x48] sm:$0xff]   ;;  %v674_v16 = vld [vmem:[%s897_s3 + $0x50] sm:$0xff]  }
   0x6   :  { %v671_v13 = vld [vmem:[%s897_s3] sm:$0xff]   ;;  %612 = vmatprep.subr.bf16.mxu1 %v670_v11  ;;  %v673_v15 = vld [vmem:[%s897_s3 + $0x8] sm:$0xff]   ;;  %v675_v19 = vld [vmem:[%s897_s3 + $0x10] sm:$0xff]  }
   0x7   :  { %163 = vmatpush1.bf16.msra.mxu0 %v649_v4  ;;  %613 = vmatpush3.bf16.msra.mxu1 %v671_v13  ;;  %v662_v18 = vld [vmem:[%s895_s1 + $0x64] ss:$8 sps:$4 sm:$0xff]   ;;  %v664_v20 = vld [vmem:[%s895_s1 + $0x60] ss:$8 sps:$4 sm:$0xff]   ;;  %v676_v21 = vld [vmem:[%s897_s3 + $0x58] sm:$0xff]  }
   0x8   :  { %164 = vmatprep.subr.bf16.mxu0 %v650_v5  ;;  %614 = vmatprep.subr.bf16.mxu1 %v672_v14  ;;  %v665_v22 = vld [vmem:[%s895_s1 + $0x74] ss:$8 sps:$4 sm:$0xff]   ;;  %v678_v24 = vld [vmem:[%s897_s3 + $0x60] sm:$0xff]   ;;  %v667_v25 = vld [vmem:[%s895_s1 + $0x70] ss:$8 sps:$4 sm:$0xff]  }
   0x9   :  { %v677_v23 = vld [vmem:[%s897_s3 + $0x18] sm:$0xff]  }
   0xb   :  { %165 = vmatpush1.bf16.msra.mxu0 %v652_v6  ;;  %615 = vmatpush3.bf16.msra.mxu1 %v673_v15 }
   0xc   :  { %166 = vmatprep.subr.bf16.mxu0 %v653_v7  ;;  %616 = vmatprep.subr.bf16.mxu1 %v674_v16 }
   0xf   :  { %167 = vmatpush1.bf16.msra.mxu0 %v655_v8  ;;  %617 = vmatpush3.bf16.msra.mxu1 %v675_v19 }
  0x10   :  { %168 = vmatprep.subr.bf16.mxu0 %v656_v9  ;;  %618 = vmatprep.subr.bf16.mxu1 %v676_v21 }
  0x13   :  { %169 = vmatpush1.bf16.msra.mxu0 %v658_v10 }
  0x14   :  { %170 = vmatprep.subr.bf16.mxu0 %v659_v12 }
  0x17   :  { %171 = vmatpush1.bf16.msra.mxu0 %v661_v17 }
  0x18   :  { %172 = vmatprep.subr.bf16.mxu0 %v662_v18 }
  0x1b   :  { %173 = vmatpush1.bf16.msra.mxu0 %v664_v20 }
  0x1c   :  { %12 = vsyncpa [#allocation4], 0  ;;  %174 = vmatprep.subr.bf16.mxu0 %v665_v22  ;;  %619 = vmatpush3.bf16.msra.mxu1 %v677_v23  ;;  %v679_v26 = vld [vmem:[%s897_s3 + $0x20] sm:$0xff]   ;;  %v680_v27 = vld [vmem:[%s897_s3 + $0x68] sm:$0xff]   ;;  %v58_v35 = vlaneseq  ;;  %s719_s30 = smov [#allocation3]  }
  0x1d   :  { %620 = vmatprep.subr.bf16.mxu1 %v678_v24  ;;  %v668_v28 = vld [vmem:[%s894_s0] sm:$0xff]   ;;  %v669_v29 = vld [vmem:[%s894_s0 + $0x8] sm:$0xff]   ;;  %v682_v31 = vld [vmem:[%s897_s3 + $0x70] sm:$0xff]  }
  0x1e   :  { %v681_v30 = vld [vmem:[%s897_s3 + $0x28] sm:$0xff]   ;;  %v683_v32 = vld [vmem:[%s897_s3 + $0x30] sm:$0xff]   ;;  %v684_v33 = vld [vmem:[%s897_s3 + $0x78] sm:$0xff]   ;;  %v59_v36 = vshrl.u32 %v58_v35, 7 }
  0x1f   :  { %175 = vmatpush1.bf16.msra.mxu0 %v667_v25  ;;  %v685_v34 = vld [vmem:[%s897_s3 + $0x38] sm:$0xff]   ;;  %v56_v38 = vld [vmem:[%s896_s2] sm:$0x3]  ;;  %v610_v19 = vld [vmem:[%s894_s0 + $0x8] sm:$0xff]  }
  0x20   :  { %621 = vmatpush3.bf16.msra.mxu1 %v679_v26  ;;  %v60_v37 = vsub.s32 0, %v59_v36  ;;  %v64_v39 = vsub.s32 1, %v59_v36  ;;  %v593_v6 = vld [vmem:[%s894_s0] sm:$0xff]   ;;  %v598_v25 = vunpack.c.l.bf16 %v610_v19 }
  0x21   :  { %622 = vmatprep.subr.bf16.mxu1 %v680_v27  ;;  %v581_v9 = vld [vmem:[%s898_s4] ss:$0 sm:$0xff]  ;;  %v594_v12 = vunpack.c.l.bf16 %v593_v6  ;;  %v595_v18 = vunpack.c.h.bf16 %v593_v6 }
  0x22   :  { %193 = vmatmul.mubr.bf16.vlgmr.msra.gmra.mrb[0].mxu0 %v668_v28  ;;  %v61_v40 = vrot.slane %v56_v38, %v60_v37  ;;  %v65_v41 = vrot.slane %v56_v38, %v64_v39 }
  0x23   :  { %202 = vmatprep.mubr.bf16.mxu0 %v718_v2 }
  0x24   :  { %623 = vmatpush3.bf16.msra.mxu1 %v681_v30 }
  0x25   :  { %624 = vmatprep.subr.bf16.mxu1 %v682_v31  ;;  %v599_v31 = vunpack.c.h.bf16 %v610_v19 }
  0x28   :  { %625 = vmatpush3.bf16.msra.mxu1 %v683_v32 }
  0x29   :  { %626 = vmatprep.subr.bf16.mxu1 %v684_v33 }
  0x2a   :  { %203 = vmatmul.mubr.bf16.gmra.mrb[4].mxu0 %v669_v29 }
  0x2c   :  { %627 = vmatpush3.bf16.msra.mxu1 %v685_v34 }
  0xf5   :  { %v194_v42 = vpop.f32.mrb[0].mxu0 }
  0xf6   :  { %v195_v43 = vadd.f32 %v194_v42, %v61_v40  ;;  %v196_v44 = vpop.f32.mrb[1].mxu0 }
  0xf7   :  { %v197_v45 = vadd.f32 %v196_v44, %v65_v41  ;;  %v198_v46 = vpop.f32.mrb[2].mxu0 }
  0xf8   :  { %v199_v47 = vadd.f32 %v198_v46, %v61_v40  ;;  %v200_v48 = vpop.f32.mrb[3].mxu0  ;;  %v213_v50 = vmax.f32 %v195_v43, 0.0 }
  0xf9   :  { %v201_v49 = vadd.f32 %v200_v48, %v65_v41  ;;  %v214_v52 = vmax.f32 %v197_v45, 0.0 }
  0xfa   :  { %v215_v51 = vmax.f32 %v199_v47, 0.0 }
  0xfb   :  { %v216_v53 = vmax.f32 %v201_v49, 0.0 }
  0xfc   :  { %v225_v54 = vpack.c.bf16 %v215_v51, %v213_v50 }
  0xfd   :  { %v204_v55 = vpop.f32.mrb[4].mxu0  ;;  %v226_v56 = vpack.c.bf16 %v216_v53, %v214_v52 }
  0xfe   :  { %v205_v57 = vadd.f32 %v204_v55, %v61_v40  ;;  %v206_v58 = vpop.f32.mrb[5].mxu0 }
  0xff   :  { %v207_v59 = vadd.f32 %v206_v58, %v65_v41  ;;  %v208_v60 = vpop.f32.mrb[6].mxu0  ;;  %389 = vmatprep.mubr.bf16.mxu1 %v226_v56 }
 0x100   :  { %v209_v61 = vadd.f32 %v208_v60, %v61_v40  ;;  %v210_v62 = vpop.f32.mrb[7].mxu0  ;;  %390 = vmatmul.mubr.bf16.vlgmr.msra.gmra.mrb[0].mxu1 %v225_v54  ;;  %v217_v0 = vmax.f32 %v205_v57, 0.0 }
 0x101   :  { %v211_v63 = vadd.f32 %v210_v62, %v65_v41  ;;  %v218_v2 = vmax.f32 %v207_v59, 0.0 }
 0x102   :  { %v219_v1 = vmax.f32 %v209_v61, 0.0 }
 0x103   :  { %v220_v3 = vmax.f32 %v211_v63, 0.0  ;;  %v582_v63 = vld [vmem:[%s899_s5] ss:$0 sm:$0xff]  ;;  %s536_s5 = sshll.u32 %s719_s30, 4  ;;  %s537_s5 = int_to_ptr.vmem [resolvable:$true] %s536_s5 }
 0x104   :  { %v227_v4 = vpack.c.bf16 %v219_v1, %v217_v0  ;;  %s694_s8 = scalar_lea.vmem %s537_s5, 256  ;;  %p699_p1 = scmp.lt.s32.totalorder %s537_s5, %s537_s5 }
 0x105   :  { %v228_v5 = vpack.c.bf16 %v220_v3, %v218_v2  ;;  %v583_v3 = vld [vmem:[%s900_s6] ss:$0 sm:$0xff]  ;;  %p695_p0 = scmp.ne.s32.totalorder %s537_s5, %s694_s8  ;;  %p700_p2 = scmp.lt.s32.totalorder %s694_s8, %s694_s8 }
 0x107   :  { %397 = vmatprep.mubr.bf16.mxu1 %v228_v5  ;;  %p701_p3 = por %p700_p2, %p699_p1 }
 0x108   :  { %398 = vmatmul.mubr.bf16.gmra.mrb[4].mxu1 %v227_v4 }
 0x109   :  { %p702_p4 = pnand %p701_p3, %p695_p0 }
 0x1d3   :  { %v628_v7 = vpop.f32.mrb[0].mxu1 }
 0x1d4   :  { %v629_v8 = vpop.f32.mrb[1].mxu1 }
 0x1d5   :  { %v630_v10 = vadd.f32 %v629_v8, %v628_v7  ;;  %v631_v11 = vpop.f32.mrb[2].mxu1 }
 0x1d6   :  { %v632_v13 = vpop.f32.mrb[3].mxu1 }
 0x1d7   :  { %v428_v14 = vadd.f32 %v630_v10, %v581_v9  ;;  %v633_v15 = vadd.f32 %v632_v13, %v631_v11 }
 0x1d9   :  { %v429_v16 = vadd.f32 %v633_v15, %v581_v9  ;;  %v440_v17 = vadd.f32 %v594_v12, %v428_v14 }
 0x1db   :  { %v634_v20 = vpop.f32.mrb[4].mxu1  ;;  %444 = vadd.xlane.f32.xlu0 %v440_v17  ;;  %v441_v24 = vadd.f32 %v595_v18, %v429_v16 }
 0x1dc   :  { %v635_v21 = vpop.f32.mrb[5].mxu1 }
 0x1dd   :  { %v636_v22 = vadd.f32 %v635_v21, %v634_v20  ;;  %v637_v23 = vpop.f32.mrb[6].mxu1 }
 0x1de   :  { %v638_v26 = vpop.f32.mrb[7].mxu1 }
 0x1df   :  { %v430_v27 = vadd.f32 %v636_v22, %v581_v9  ;;  %v639_v28 = vadd.f32 %v638_v26, %v637_v23  ;;  %446 = vadd.xlane.f32.xlu0 %v441_v24 }
 0x1e1   :  { %v431_v29 = vadd.f32 %v639_v28, %v581_v9  ;;  %v442_v30 = vadd.f32 %v598_v25, %v430_v27 }
 0x1e3   :  { %448 = vadd.xlane.f32.xlu1 %v442_v30  ;;  %v443_v32 = vadd.f32 %v599_v31, %v431_v29 }
 0x1e7   :  { %450 = vadd.xlane.f32.xlu1 %v443_v32 }
 0x268   :  { %v445_v33 = vpop.xlane.xlu0 %444 }
 0x269   :  { %v453_v34 = vmul.f32 0.0078125, %v445_v33 }
 0x26b   :  { %v457_v35 = vsub.f32 %v440_v17, %v453_v34 }
 0x26c   :  { %v447_v36 = vpop.xlane.xlu0 %446 }
 0x26d   :  { %v454_v37 = vmul.f32 0.0078125, %v447_v36  ;;  %v461_v38 = vmul.f32 %v457_v35, %v457_v35 }
 0x26f   :  { %v458_v39 = vsub.f32 %v441_v24, %v454_v37  ;;  %465 = vadd.xlane.f32.xlu0 %v461_v38 }
 0x270   :  { %v449_v40 = vpop.xlane.xlu1 %448 }
 0x271   :  { %v455_v41 = vmul.f32 0.0078125, %v449_v40  ;;  %v462_v42 = vmul.f32 %v458_v39, %v458_v39 }
 0x273   :  { %v459_v43 = vsub.f32 %v442_v30, %v455_v41  ;;  %467 = vadd.xlane.f32.xlu1 %v462_v42 }
 0x274   :  { %v451_v44 = vpop.xlane.xlu1 %450 }
 0x275   :  { %v456_v45 = vmul.f32 0.0078125, %v451_v44  ;;  %v463_v46 = vmul.f32 %v459_v43, %v459_v43 }
 0x277   :  { %v460_v47 = vsub.f32 %v443_v32, %v456_v45  ;;  %469 = vadd.xlane.f32.xlu0 %v463_v46 }
 0x279   :  { %v464_v48 = vmul.f32 %v460_v47, %v460_v47 }
 0x27b   :  { %471 = vadd.xlane.f32.xlu1 %v464_v48 }
 0x2fc   :  { %v466_v49 = vpop.xlane.xlu0 %465 }
 0x2fd   :  { %v473_v50 = vmul.f32 0.0078125, %v466_v49 }
 0x2ff   :  { %v477_v51 = vadd.f32 1e-05, %v473_v50 }
 0x300   :  { %v468_v52 = vpop.xlane.xlu1 %467 }
 0x301   :  { %686 = vrsqrt.f32 %v477_v51  ;;  %v474_v53 = vmul.f32 0.0078125, %v468_v52 }
 0x303   :  { %v478_v54 = vadd.f32 1e-05, %v474_v53 }
 0x304   :  { %v470_v55 = vpop.xlane.xlu0 %469 }
 0x305   :  { %688 = vrsqrt.f32 %v478_v54  ;;  %v475_v56 = vmul.f32 0.0078125, %v470_v55 }
 0x307   :  { %v479_v57 = vadd.f32 1e-05, %v475_v56 }
 0x308   :  { %v472_v58 = vpop.xlane.xlu1 %471 }
 0x309   :  { %690 = vrsqrt.f32 %v479_v57  ;;  %v476_v59 = vmul.f32 0.0078125, %v472_v58 }
 0x30b   :  { %v687_v60 = vpop.eup %686  ;;  %v480_v61 = vadd.f32 1e-05, %v476_v59 }
 0x30c   :  { %v485_v62 = vmul.f32 %v687_v60, %v457_v35 }
 0x30d   :  { %692 = vrsqrt.f32 %v480_v61 }
 0x30e   :  { %v496_v2 = vmul.f32 %v582_v63, %v485_v62 }
 0x30f   :  { %v689_v0 = vpop.eup %688 }
 0x310   :  { %v486_v1 = vmul.f32 %v689_v0, %v458_v39  ;;  %v507_v7 = vadd.f32 %v583_v3, %v496_v2 }
 0x312   :  { %v497_v4 = vmul.f32 %v582_v63, %v486_v1 }
 0x313   :  { %v691_v5 = vpop.eup %690 }
 0x314   :  { %v487_v6 = vmul.f32 %v691_v5, %v459_v43  ;;  %v508_v8 = vadd.f32 %v583_v3, %v497_v4 }
 0x316   :  { %v603_v9 = vpack.c.bf16 %v508_v8, %v507_v7  ;;  %v498_v12 = vmul.f32 %v582_v63, %v487_v6 }
 0x317   :  { %v693_v10 = vpop.eup %692 }
 0x318   :  { %v488_v11 = vmul.f32 %v693_v10, %v460_v47  ;;  %604 = vst [vmem:[#allocation3] sm:$0xff] %v603_v9   ;;  %v509_v14 = vadd.f32 %v583_v3, %v498_v12 }
 0x31a   :  { %v499_v13 = vmul.f32 %v582_v63, %v488_v11 }
 0x31c   :  { %v510_v15 = vadd.f32 %v583_v3, %v499_v13 }
 0x31e   :  { %v608_v16 = vpack.c.bf16 %v510_v15, %v509_v14 }
 0x320   :  { %611 = vst [vmem:[#allocation3 + $0x8] sm:$0xff] %v608_v16  }
 0x321   :  { %705 = shalt.err (!%p702_p4)
}
 0x322   :  { %s706_s10 = scalar_lea.hbm %s901_s7, 256 }
 0x323   :  { %p707_p5 = scmp.ne.s32.totalorder %s901_s7, %s706_s10  ;;  %p710_p6 = scmp.lt.u32.totalorder %s706_s10, %s901_s7 }
 0x325   :  { %p712_p7 = pnand %p710_p6, %p707_p5 }
 0x327   :  { %715 = shalt.err (!%p712_p7)
}
 0x328   :  { %s720_s14 = smov 64   ;;  %s721_s15 = smov 4  }
 0x329   :  { %542 = dma.vmem_to_hbm [thread:$0]  %s537_s5, 256, %s901_s7, [#allocation4], %s720_s14, %s720_s14, %s721_s15  }
 0x32a   :  { %716 = dma.done.wait [#allocation4], 256  }
 0x32b   :  { %717 = vsyncadd [#allocation4], 4294967040 }
 0x32c   :  { %546 = vsyncpa [#allocation4], 1 }

</bundles_post_ra>
